<compile_context>
chip_gen: v5e
topology: v5e:2x2
jax: 0.10.0
libtpu: 0.0.40
codegen_flags: <defaults>
</compile_context>

<pallas_src>
import functools
import math

import jax
import jax.numpy as jnp
from jax.experimental import pallas as pl
from jax.experimental.pallas import tpu as pltpu


def _round_up(x, m):
    return ((x + m - 1) // m) * m


# ----------------------------------------------------------------------------
# Kernel: fused multi-layer perceptron on one (tm, in_dim) row tile.
# refs = (x_ref, w0, b0, w1, b1, ..., wL-1, bL-1, o_ref)
# ----------------------------------------------------------------------------
def _fused_mlp_kernel(*refs, num_layers, activation, final_sigmoid):
    x_ref = refs[0]
    o_ref = refs[-1]
    wb_refs = refs[1:-1]

    h = x_ref[...]  # f32 row tile; resident for the whole layer stack
    for li in range(num_layers):
        w_ref = wb_refs[2 * li]        # (K, N) bf16 weight block
        b_ref = wb_refs[2 * li + 1]    # (1, N) f32 bias block
        # bf16 MXU operands, f32 accumulation; bias/activation stay in f32 on
        # the VPU/EUP while the tile is still resident in VMEM/vregs.
        h = jnp.dot(h.astype(jnp.bfloat16), w_ref[...],
                    preferred_element_type=jnp.float32)
        h = h + b_ref[...]
        if li != num_layers - 1:
            if activation == "relu":
                h = jnp.maximum(h, 0.0)
            else:  # 'sigmoid'
                h = jax.nn.sigmoid(h)
        elif final_sigmoid:
            h = jax.nn.sigmoid(h)
    o_ref[...] = h.astype(o_ref.dtype)


def _pick_row_tile(row_tile, M, dims_padded, vmem_budget):
    """Largest sublane-aligned row tile whose working set fits the budget."""
    tm = min(row_tile, _round_up(M, 8))
    # Give v7x's two TensorCores >= 2 grid steps when there is enough work.
    if M >= 256:
        tm = min(tm, _round_up(-(-M // 2), 8))
    in_dim, out_pad = dims_padded[0], dims_padded[-1]
    max_w = max(dims_padded)
    # Resident weights/biases (pipeliner allocates 2 buffers each, but they are
    # fetched only once since their block index is constant).
    fixed = sum(2 * k * n * 2 for k, n in zip(dims_padded[:-1], dims_padded[1:]))
    fixed += sum(2 * n * 4 for n in dims_padded[1:])
    while tm > 8:
        per_tile = (2 * tm * in_dim * 4        # x tile, double-buffered
                    + 2 * tm * out_pad * 4     # out tile, double-buffered
                    + 3 * tm * max_w * 4)      # live f32/bf16 intermediates
        if fixed + per_tile <= vmem_budget:
            break
        tm = max(8, _round_up(tm // 2, 8))
    return tm


# ----------------------------------------------------------------------------
# Wrapper: flatten leading dims, single fused pallas_call over row tiles.
# ----------------------------------------------------------------------------
def mlp_forward(params, x, *, activation="relu", discrim=False, row_tile=512):
    """Fused MLP forward.  x: (..., input_dim) -> (..., output_dim)."""
    weights = params["weights"]
    biases = params["biases"]
    num_layers = len(weights)
    assert num_layers == len(biases)

    lead_shape = x.shape[:-1]
    in_dim = x.shape[-1]
    out_dim = int(weights[-1].shape[1])
    M = int(math.prod(lead_shape)) if lead_shape else 1
    x2d = x.reshape(M, in_dim)

    # Lane-dense output: pad the final layer's N up to a multiple of 128 so the
    # output stores are unmasked vst; padded columns are sliced off afterwards.
    out_pad = _round_up(out_dim, 128)

    # VMEM budget (v7x: 64 MiB/TC; v5e/v6e: 128 MiB).  Keep headroom.
    try:
        vmem_cap = int(pltpu.get_tpu_info().vmem_capacity_bytes)
    except Exception:  # conservative default if the query is unavailable
        vmem_cap = 64 * 1024 * 1024
    vmem_limit = min(int(vmem_cap * 0.75), 100 * 1024 * 1024)

    hidden_dims = [int(w.shape[1]) for w in weights[:-1]]
    dims_padded = [in_dim] + hidden_dims + [out_pad]
    tm = _pick_row_tile(row_tile, M, dims_padded, int(vmem_limit * 0.8))

    args = [x2d]
    in_specs = [pl.BlockSpec((tm, in_dim), lambda i: (i, 0))]
    flops = 0
    weight_bytes = 0
    for li, (w, b) in enumerate(zip(weights, biases)):
        K, N = int(w.shape[0]), int(w.shape[1])
        if li == num_layers - 1 and out_pad != N:
            w = jnp.pad(w, ((0, 0), (0, out_pad - N)))
            b = jnp.pad(b, (0, out_pad - N))
            N = out_pad
        # bf16 weights (MXU operands); f32 biases (VPU add in f32).
        args.append(w.astype(jnp.bfloat16))
        args.append(b.reshape(1, N).astype(jnp.float32))
        # Full weight/bias blocks, constant index_map -> resident across the
        # whole row-tile grid, DMA'd from HBM exactly once.
        in_specs.append(pl.BlockSpec((K, N), lambda i: (0, 0)))
        in_specs.append(pl.BlockSpec((1, N), lambda i: (0, 0)))
        flops += 2 * M * K * N
        weight_bytes += K * N * 2 + N * 4

    transcendentals = 0
    if activation == "sigmoid":
        transcendentals += M * sum(hidden_dims)
    if discrim:
        transcendentals += M * out_dim

    kern = functools.partial(
        _fused_mlp_kernel,
        num_layers=num_layers,
        activation=activation,
        final_sigmoid=bool(discrim),
    )
    # No wrapper-side row padding: Pallas masks the partial last row block
    # (rows are independent, so junk in the padded read region cannot
    # contaminate valid rows).
    out = pl.pallas_call(
        kern,
        out_shape=jax.ShapeDtypeStruct((M, out_pad), x.dtype),
        grid=(pl.cdiv(M, tm),),
        in_specs=in_specs,
        out_specs=pl.BlockSpec((tm, out_pad), lambda i: (i, 0)),
        compiler_params=pltpu.CompilerParams(
            dimension_semantics=("parallel",),
            vmem_limit_bytes=vmem_limit),
        cost_estimate=pl.CostEstimate(
            flops=flops,
            transcendentals=transcendentals,
            bytes_accessed=M * in_dim * 4 + weight_bytes + M * out_pad * 4),
    )(*args)

    out = out[:, :out_dim]
    return out.reshape(lead_shape + (out_dim,))


# ----------------------------------------------------------------------------
# Parameter init (PyTorch nn.Linear-style uniform(-1/sqrt(fan_in), +...))
# ----------------------------------------------------------------------------
def init_mlp_params(key, input_dim, output_dim, hidden_size=(1024, 512)):
    dims = [input_dim] + list(hidden_size) + [output_dim]
    weights, biases = [], []
    keys = jax.random.split(key, len(dims) - 1)
    for i in range(len(dims) - 1):
        kw, kb = jax.random.split(keys[i])
        bound = 1.0 / math.sqrt(dims[i])
        w = jax.random.uniform(kw, (dims[i], dims[i + 1]), jnp.float32,
                               -bound, bound)
        b = jax.random.uniform(kb, (dims[i + 1],), jnp.float32, -bound, bound)
        weights.append(w)
        biases.append(b)
    return {"weights": weights, "biases": biases}


# Pure-JAX reference (mirrors the PyTorch forward) for a correctness check.
def mlp_reference(params, x, *, activation="relu", discrim=False):
    weights, biases = params["weights"], params["biases"]
    h = x
    for i, (w, b) in enumerate(zip(weights, biases)):
        h = h @ w + b
        if i != len(weights) - 1:
            h = jnp.maximum(h, 0.0) if activation == "relu" else jax.nn.sigmoid(h)
        elif discrim:
            h = jax.nn.sigmoid(h)
    return h


# ----------------------------------------------------------------------------
# Driver
# ----------------------------------------------------------------------------
if __name__ == "__main__":
    # Module defaults: hidden_size=(1024, 512), activation='relu',
    # discrim=False, dropout=-1 (no dropout, no final sigmoid).
    # TODO(synk): dropout branch (dropout != -1) not implemented — it is a
    # training-time stochastic op and is disabled by the module's default.
    input_dim = 32
    output_dim = 16
    hidden_size = (1024, 512)
    batch, seq = 2, 8

    key = jax.random.PRNGKey(0)
    kp, kx = jax.random.split(key)
    params = init_mlp_params(kp, input_dim, output_dim, hidden_size)
    x = jax.random.normal(kx, (batch, seq, input_dim), jnp.float32)

    fwd = jax.jit(functools.partial(mlp_forward, activation="relu",
                                    discrim=False))
    out = fwd(params, x)
    out = jax.block_until_ready(out)

    assert out.shape == (batch, seq, output_dim)
    assert jnp.isfinite(out).all()

    ref = mlp_reference(params, x, activation="relu", discrim=False)
    # bf16 MXU operands with f32 accumulation -> looser tolerance than pure f32.
    assert jnp.allclose(out, ref, atol=3e-2, rtol=3e-2), (
        float(jnp.max(jnp.abs(out - ref))))

    print("KERNEL_OK")
</pallas_src>

<mosaic_0001>
module attributes {stable_mosaic.version = 11 : i64} {
  func.func @_fused_mlp_kernel(%arg0: i32, %arg1: memref<16x32xf32, #tpu.memory_space<vmem>>, %arg2: memref<32x1024xbf16, #tpu.memory_space<vmem>>, %arg3: memref<1x1024xf32, #tpu.memory_space<vmem>>, %arg4: memref<1024x512xbf16, #tpu.memory_space<vmem>>, %arg5: memref<1x512xf32, #tpu.memory_space<vmem>>, %arg6: memref<512x128xbf16, #tpu.memory_space<vmem>>, %arg7: memref<1x128xf32, #tpu.memory_space<vmem>>, %arg8: memref<16x128xf32, #tpu.memory_space<vmem>>) attributes {dimension_semantics = [#tpu.dimension_semantics<parallel>], iteration_bounds = array<i64: 1>, scalar_prefetch = 0 : i64, scratch_operands = 0 : i64, tpu.core_type = #tpu.core_type<tc>, window_params = [{transform_indices = @transform_0, window_bounds = array<i64: 16, 32>}, {pipeline_mode = #tpu.pipeline_mode<synchronous>, transform_indices = @transform_1, window_bounds = array<i64: 32, 1024>}, {pipeline_mode = #tpu.pipeline_mode<synchronous>, transform_indices = @transform_2, window_bounds = array<i64: 1, 1024>}, {pipeline_mode = #tpu.pipeline_mode<synchronous>, transform_indices = @transform_3, window_bounds = array<i64: 1024, 512>}, {pipeline_mode = #tpu.pipeline_mode<synchronous>, transform_indices = @transform_4, window_bounds = array<i64: 1, 512>}, {pipeline_mode = #tpu.pipeline_mode<synchronous>, transform_indices = @transform_5, window_bounds = array<i64: 512, 128>}, {pipeline_mode = #tpu.pipeline_mode<synchronous>, transform_indices = @transform_6, window_bounds = array<i64: 1, 128>}, {transform_indices = @transform_7, window_bounds = array<i64: 16, 128>}]} {
    %c0 = arith.constant 0 : index
    %c0_0 = arith.constant 0 : index
    %0 = vector.load %arg1[%c0, %c0_0] : memref<16x32xf32, #tpu.memory_space<vmem>>, vector<16x32xf32>
    %1 = arith.truncf %0 : vector<16x32xf32> to vector<16x32xbf16>
    %c0_1 = arith.constant 0 : index
    %c0_2 = arith.constant 0 : index
    %2 = vector.load %arg2[%c0_1, %c0_2] : memref<32x1024xbf16, #tpu.memory_space<vmem>>, vector<32x1024xbf16>
    %cst = arith.constant dense<0.000000e+00> : vector<16x1024xf32>
    %3 = tpu.matmul %1, %2, %cst {dimension_numbers = #tpu.dot_dimension_numbers<[1], [0], [0], [1], [0, 0, 1, 1], [], []>} : vector<16x32xbf16>, vector<32x1024xbf16>, vector<16x1024xf32> -> vector<16x1024xf32>
    %c0_3 = arith.constant 0 : index
    %c0_4 = arith.constant 0 : index
    %4 = vector.load %arg3[%c0_3, %c0_4] : memref<1x1024xf32, #tpu.memory_space<vmem>>, vector<1x1024xf32>
    %5 = vector.broadcast %4 : vector<1x1024xf32> to vector<16x1024xf32>
    %6 = arith.addf %3, %5 : vector<16x1024xf32>
    %cst_5 = arith.constant 0.000000e+00 : f32
    %7 = vector.broadcast %cst_5 : f32 to vector<16x1024xf32>
    %8 = arith.maximumf %6, %7 : vector<16x1024xf32>
    %9 = arith.truncf %8 : vector<16x1024xf32> to vector<16x1024xbf16>
    %c0_6 = arith.constant 0 : index
    %c0_7 = arith.constant 0 : index
    %10 = vector.load %arg4[%c0_6, %c0_7] : memref<1024x512xbf16, #tpu.memory_space<vmem>>, vector<1024x512xbf16>
    %cst_8 = arith.constant dense<0.000000e+00> : vector<16x512xf32>
    %11 = tpu.matmul %9, %10, %cst_8 {dimension_numbers = #tpu.dot_dimension_numbers<[1], [0], [0], [1], [0, 0, 1, 1], [], []>} : vector<16x1024xbf16>, vector<1024x512xbf16>, vector<16x512xf32> -> vector<16x512xf32>
    %c0_9 = arith.constant 0 : index
    %c0_10 = arith.constant 0 : index
    %12 = vector.load %arg5[%c0_9, %c0_10] : memref<1x512xf32, #tpu.memory_space<vmem>>, vector<1x512xf32>
    %13 = vector.broadcast %12 : vector<1x512xf32> to vector<16x512xf32>
    %14 = arith.addf %11, %13 : vector<16x512xf32>
    %cst_11 = arith.constant 0.000000e+00 : f32
    %15 = vector.broadcast %cst_11 : f32 to vector<16x512xf32>
    %16 = arith.maximumf %14, %15 : vector<16x512xf32>
    %17 = arith.truncf %16 : vector<16x512xf32> to vector<16x512xbf16>
    %c0_12 = arith.constant 0 : index
    %c0_13 = arith.constant 0 : index
    %18 = vector.load %arg6[%c0_12, %c0_13] : memref<512x128xbf16, #tpu.memory_space<vmem>>, vector<512x128xbf16>
    %cst_14 = arith.constant dense<0.000000e+00> : vector<16x128xf32>
    %19 = tpu.matmul %17, %18, %cst_14 {dimension_numbers = #tpu.dot_dimension_numbers<[1], [0], [0], [1], [0, 0, 1, 1], [], []>} : vector<16x512xbf16>, vector<512x128xbf16>, vector<16x128xf32> -> vector<16x128xf32>
    %c0_15 = arith.constant 0 : index
    %c0_16 = arith.constant 0 : index
    %20 = vector.load %arg7[%c0_15, %c0_16] : memref<1x128xf32, #tpu.memory_space<vmem>>, vector<1x128xf32>
    %21 = vector.broadcast %20 : vector<1x128xf32> to vector<16x128xf32>
    %22 = arith.addf %19, %21 : vector<16x128xf32>
    %c0_17 = arith.constant 0 : index
    %c0_18 = arith.constant 0 : index
    %23 = vector.load %arg8[%c0_17, %c0_18] : memref<16x128xf32, #tpu.memory_space<vmem>>, vector<16x128xf32>
    tpu.vector_store %arg8[%c0_17, %c0_18], %22 {strides = array<i32>} : memref<16x128xf32, #tpu.memory_space<vmem>>, vector<16x128xf32>,
    return
  }
  func.func @transform_0(%arg0: i32) -> (i32, i32) {
    %c0_i32 = arith.constant 0 : i32
    %c0_i32_0 = arith.constant 0 : i32
    return %arg0, %c0_i32 : i32, i32
  }
  func.func @transform_1(%arg0: i32) -> (i32, i32) {
    %c0_i32 = arith.constant 0 : i32
    %c0_i32_0 = arith.constant 0 : i32
    %c0_i32_1 = arith.constant 0 : i32
    return %c0_i32, %c0_i32_0 : i32, i32
  }
  func.func @transform_2(%arg0: i32) -> (i32, i32) {
    %c0_i32 = arith.constant 0 : i32
    %c0_i32_0 = arith.constant 0 : i32
    %c0_i32_1 = arith.constant 0 : i32
    return %c0_i32, %c0_i32_0 : i32, i32
  }
  func.func @transform_3(%arg0: i32) -> (i32, i32) {
    %c0_i32 = arith.constant 0 : i32
    %c0_i32_0 = arith.constant 0 : i32
    %c0_i32_1 = arith.constant 0 : i32
    return %c0_i32, %c0_i32_0 : i32, i32
  }
  func.func @transform_4(%arg0: i32) -> (i32, i32) {
    %c0_i32 = arith.constant 0 : i32
    %c0_i32_0 = arith.constant 0 : i32
    %c0_i32_1 = arith.constant 0 : i32
    return %c0_i32, %c0_i32_0 : i32, i32
  }
  func.func @transform_5(%arg0: i32) -> (i32, i32) {
    %c0_i32 = arith.constant 0 : i32
    %c0_i32_0 = arith.constant 0 : i32
    %c0_i32_1 = arith.constant 0 : i32
    return %c0_i32, %c0_i32_0 : i32, i32
  }
  func.func @transform_6(%arg0: i32) -> (i32, i32) {
    %c0_i32 = arith.constant 0 : i32
    %c0_i32_0 = arith.constant 0 : i32
    %c0_i32_1 = arith.constant 0 : i32
    return %c0_i32, %c0_i32_0 : i32, i32
  }
  func.func @transform_7(%arg0: i32) -> (i32, i32) {
    %c0_i32 = arith.constant 0 : i32
    %c0_i32_0 = arith.constant 0 : i32
    return %arg0, %c0_i32 : i32, i32
  }
}

</mosaic_0001>

<bundles_post_ra>
// kernel: mlp_forward.1
= control target key start
LH: loop header
LB: loop body
LE: loop exit
PB: predicated region body
PF: predicated region fallthrough
CT: control target
= control target key end

     0   :  { %vm144_vm0 = vcmask 261120   ;;  %s6060_s1 = inlined_call_operand.vmem [shape: bf16[32,1024], index: 1, kind: input, shape index: {}]   ;;  %s6061_s0 = inlined_call_operand.vmem [shape: f32[16,32], index: 0, kind: input, shape index: {}]   ;;  %s6062_s3 = inlined_call_operand.vmem [shape: bf16[1024,512], index: 3, kind: input, shape index: {}]   ;;  %s6063_s2 = inlined_call_operand.vmem [shape: f32[1,1024], index: 2, kind: input, shape index: {}]   ;;  %s6064_s4 = inlined_call_operand.vmem [shape: f32[1,512], index: 4, kind: input, shape index: {}]   ;;  %s6065_s5 = inlined_call_operand.vmem [shape: bf16[512,128], index: 5, kind: input, shape index: {}]   ;;  %s6066_s6 = inlined_call_operand.vmem [shape: f32[1,128], index: 6, kind: input, shape index: {}]   ;;  %s6067_s7 = inlined_call_operand.vmem [shape: f32[16,128], index: 7, kind: output, shape index: {}]  }
   0x1   :  { %v2646_v0 = vld [vmem:[%s6060_s1 + $0x40] sm:$0xf]  ;;  %v3844_v2 = vld [vmem:[%s6060_s1 + $0x44] sm:$0xf]  ;;  %v2654_v5 = vld [vmem:[%s6060_s1 + $0x48] sm:$0xf] }
   0x2   :  { %v3848_v1 = vld [vmem:[%s6060_s1 + $0x5c] sm:$0xf0]  ;;  %v2648_v4 = vld [vmem:[%s6060_s1 + $0x60] sm:$0xf0]  ;;  %v3849_v6 = vld [vmem:[%s6060_s1 + $0x64] sm:$0xf0] }
   0x3   :  { %v2647_v3 = vor.u32 %v3848_v1, %v2646_v0  ;;  %v2651_v7 = vor.u32 %v3844_v2, %v2648_v4  ;;  %v2655_v8 = vor.u32 %v3849_v6, %v2654_v5  ;;  %v3845_v9 = vld [vmem:[%s6060_s1 + $0x4c] sm:$0xf]  ;;  %v2614_v11 = vld [vmem:[%s6060_s1] sm:$0xf]  ;;  %v3836_v14 = vld [vmem:[%s6060_s1 + $0x4] sm:$0xf] }
   0x4   :  { %v2656_v10 = vld [vmem:[%s6060_s1 + $0x68] sm:$0xf0]  ;;  %v3840_v13 = vld [vmem:[%s6060_s1 + $0x1c] sm:$0xf0]  ;;  %v2616_v15 = vld [vmem:[%s6060_s1 + $0x20] sm:$0xf0] }
   0x5   :  { %154 = vmatpush.bf16.msra.mxu0 %v2647_v3  ;;  %v2659_v12 = vor.u32 %v3845_v9, %v2656_v10  ;;  %168 = vmatpush.bf16.msra.mxu1 %v2651_v7  ;;  %v2615_v16 = vor.u32 %v3840_v13, %v2614_v11  ;;  %v2619_v17 = vor.u32 %v3836_v14, %v2616_v15  ;;  %v2622_v18 = vld [vmem:[%s6060_s1 + $0x8] sm:$0xf]  ;;  %v3837_v20 = vld [vmem:[%s6060_s1 + $0xc] sm:$0xf]  ;;  %v27_v23 = vld [vmem:[%s6061_s0] sm:$0xff] }
   0x6   :  { %182 = vmatpush.bf16.msra.mxu2 %v2655_v8  ;;  %v3841_v19 = vld [vmem:[%s6060_s1 + $0x24] sm:$0xf0]  ;;  %v2624_v22 = vld [vmem:[%s6060_s1 + $0x28] sm:$0xf0]  ;;  %v2662_v27 = vld [vmem:[%s6060_s1 + $0x50] sm:$0xf] }
   0x7   :  { %196 = vmatpush.bf16.msra.mxu3 %v2659_v12  ;;  %v2623_v21 = vor.u32 %v3841_v19, %v2622_v18  ;;  %v28_v24 = vld [vmem:[%s6061_s0 + $0x8] sm:$0xff]  ;;  %v2627_v25 = vor.u32 %v3837_v20, %v2624_v22  ;;  %v3850_v28 = vld [vmem:[%s6060_s1 + $0x6c] sm:$0xf0]  ;;  %v3846_v29 = vld [vmem:[%s6060_s1 + $0x54] sm:$0xf] }
   0x8   :  { %v4235_v26 = vpack.c.bf16 %v28_v24, %v27_v23  ;;  %v2663_v30 = vor.u32 %v3850_v28, %v2662_v27  ;;  %v2664_v31 = vld [vmem:[%s6060_s1 + $0x70] sm:$0xf0]  ;;  %v2670_v32 = vld [vmem:[%s6060_s1 + $0x58] sm:$0xf]  ;;  %v3847_v36 = vld [vmem:[%s6060_s1 + $0x5c] sm:$0xf] }
   0x9   :  { %155 = vmatpush.bf16.msra.mxu0 %v2615_v16  ;;  %v3851_v33 = vld [vmem:[%s6060_s1 + $0x74] sm:$0xf0]  ;;  %169 = vmatpush.bf16.msra.mxu1 %v2619_v17  ;;  %v2667_v34 = vor.u32 %v3846_v29, %v2664_v31  ;;  %v2672_v37 = vld [vmem:[%s6060_s1 + $0x78] sm:$0xf0]  ;;  %v2630_v38 = vld [vmem:[%s6060_s1 + $0x10] sm:$0xf] }
   0xa   :  { %183 = vmatpush.bf16.msra.mxu2 %v2623_v21  ;;  %v2671_v35 = vor.u32 %v3851_v33, %v2670_v32  ;;  %v2675_v39 = vor.u32 %v3847_v36, %v2672_v37  ;;  %v3842_v40 = vld [vmem:[%s6060_s1 + $0x2c] sm:$0xf0]  ;;  %v3838_v41 = vld [vmem:[%s6060_s1 + $0x14] sm:$0xf]  ;;  %v2638_v45 = vld [vmem:[%s6060_s1 + $0x18] sm:$0xf] }
   0xb   :  { %197 = vmatpush.bf16.msra.mxu3 %v2627_v25  ;;  %v2632_v42 = vld [vmem:[%s6060_s1 + $0x30] sm:$0xf0]  ;;  %v2631_v43 = vor.u32 %v3842_v40, %v2630_v38  ;;  %v3843_v46 = vld [vmem:[%s6060_s1 + $0x34] sm:$0xf0]  ;;  %v3839_v47 = vld [vmem:[%s6060_s1 + $0x1c] sm:$0xf] }
   0xc   :  { %2676 = vmatmul.msk.bf16.vlgmr.msra.gmra.mxu0 %vm144_vm0, %v4235_v26  ;;  %v2635_v44 = vor.u32 %v3838_v41, %v2632_v42  ;;  %2677 = vmatmul.msk.bf16.vlgmr.msra.gmra.mxu1 %vm144_vm0, %v4235_v26  ;;  %v2640_v48 = vld [vmem:[%s6060_s1 + $0x38] sm:$0xf0]  ;;  %v2798_v49 = vld [vmem:[%s6062_s3 + $0xe0] sm:$0xf]  ;;  %v3882_v50 = vld [vmem:[%s6062_s3 + $0xec] sm:$0xf0]  ;;  %v2639_v51 = vor.u32 %v3843_v46, %v2638_v45 }
   0xd   :  { %210 = vmatpush.bf16.msrb.mxu0 %v2663_v30  ;;  %224 = vmatpush.bf16.msrb.mxu1 %v2667_v34  ;;  %v2799_v52 = vor.u32 %v3882_v50, %v2798_v49  ;;  %v2926_v53 = vld [vmem:[%s6062_s3 + $0x1e0] sm:$0xf]  ;;  %v3914_v54 = vld [vmem:[%s6062_s3 + $0x1ec] sm:$0xf0]  ;;  %v2643_v56 = vor.u32 %v3839_v47, %v2640_v48 }
   0xe   :  { %2678 = vmatmul.msk.bf16.vlgmr.msra.gmra.mxu2 %vm144_vm0, %v4235_v26  ;;  %2679 = vmatmul.msk.bf16.vlgmr.msra.gmra.mxu3 %vm144_vm0, %v4235_v26  ;;  %v2782_v55 = vld [vmem:[%s6062_s3 + $0xc0] sm:$0xf]  ;;  %v2927_v57 = vor.u32 %v3914_v54, %v2926_v53  ;;  %v3878_v58 = vld [vmem:[%s6062_s3 + $0xcc] sm:$0xf0] }
   0xf   :  { %238 = vmatpush.bf16.msrb.mxu2 %v2671_v35  ;;  %252 = vmatpush.bf16.msrb.mxu3 %v2675_v39  ;;  %v2910_v59 = vld [vmem:[%s6062_s3 + $0x1c0] sm:$0xf]  ;;  %v3910_v60 = vld [vmem:[%s6062_s3 + $0x1cc] sm:$0xf0]  ;;  %v2783_v61 = vor.u32 %v3878_v58, %v2782_v55 }
  0x10   :  { %v3054_v62 = vld [vmem:[%s6062_s3 + $0x2e0] sm:$0xf]  ;;  %v3946_v63 = vld [vmem:[%s6062_s3 + $0x2ec] sm:$0xf0]  ;;  %v2911_v1 = vor.u32 %v3910_v60, %v2910_v59 }
  0x11   :  { %211 = vmatpush.bf16.msrb.mxu0 %v2631_v43  ;;  %225 = vmatpush.bf16.msrb.mxu1 %v2635_v44  ;;  %v3182_v0 = vld [vmem:[%s6062_s3 + $0x3e0] sm:$0xf]  ;;  %v3055_v2 = vor.u32 %v3946_v63, %v3054_v62  ;;  %v3978_v3 = vld [vmem:[%s6062_s3 + $0x3ec] sm:$0xf0] }
  0x12   :  { %v2766_v4 = vld [vmem:[%s6062_s3 + $0xa0] sm:$0xf]  ;;  %v3874_v5 = vld [vmem:[%s6062_s3 + $0xac] sm:$0xf0]  ;;  %v3183_v6 = vor.u32 %v3978_v3, %v3182_v0 }
  0x13   :  { %239 = vmatpush.bf16.msrb.mxu2 %v2639_v51  ;;  %v2894_v7 = vld [vmem:[%s6062_s3 + $0x1a0] sm:$0xf]  ;;  %v3906_v8 = vld [vmem:[%s6062_s3 + $0x1ac] sm:$0xf0]  ;;  %253 = vmatpush.bf16.msrb.mxu3 %v2643_v56  ;;  %v2767_v13 = vor.u32 %v3874_v5, %v2766_v4 }
  0x14   :  { %v3038_v9 = vld [vmem:[%s6062_s3 + $0x2c0] sm:$0xf]  ;;  %v3942_v10 = vld [vmem:[%s6062_s3 + $0x2cc] sm:$0xf0]  ;;  %v2895_v16 = vor.u32 %v3906_v8, %v2894_v7 }
  0x15   :  { %1830 = vmatpush.bf16.msra.mxu0 %v2799_v52  ;;  %1844 = vmatpush.bf16.msra.mxu1 %v2927_v57  ;;  %v3166_v11 = vld [vmem:[%s6062_s3 + $0x3c0] sm:$0xf]  ;;  %v3974_v12 = vld [vmem:[%s6062_s3 + $0x3cc] sm:$0xf0]  ;;  %v3039_v14 = vor.u32 %v3942_v10, %v3038_v9 }
  0x16   :  { %v3167_v15 = vor.u32 %v3974_v12, %v3166_v11  ;;  %v3022_v17 = vld [vmem:[%s6062_s3 + $0x2a0] sm:$0xf]  ;;  %v3938_v18 = vld [vmem:[%s6062_s3 + $0x2ac] sm:$0xf0] }
  0x17   :  { %1858 = vmatpush.bf16.msra.mxu2 %v3055_v2  ;;  %1872 = vmatpush.bf16.msra.mxu3 %v3183_v6  ;;  %v3150_v19 = vld [vmem:[%s6062_s3 + $0x3a0] sm:$0xf]  ;;  %v3970_v20 = vld [vmem:[%s6062_s3 + $0x3ac] sm:$0xf0]  ;;  %v3023_v24 = vor.u32 %v3938_v18, %v3022_v17 }
  0x18   :  { %v2750_v21 = vld [vmem:[%s6062_s3 + $0x80] sm:$0xf]  ;;  %v3870_v22 = vld [vmem:[%s6062_s3 + $0x8c] sm:$0xf0]  ;;  %v3151_v27 = vor.u32 %v3970_v20, %v3150_v19 }
  0x19   :  { %1831 = vmatpush.bf16.msra.mxu0 %v2783_v61  ;;  %1845 = vmatpush.bf16.msra.mxu1 %v2911_v1  ;;  %v2878_v23 = vld [vmem:[%s6062_s3 + $0x180] sm:$0xf]  ;;  %v3902_v25 = vld [vmem:[%s6062_s3 + $0x18c] sm:$0xf0]  ;;  %v2751_v32 = vor.u32 %v3870_v22, %v2750_v21 }
  0x1a   :  { %v3006_v28 = vld [vmem:[%s6062_s3 + $0x280] sm:$0xf]  ;;  %v3934_v29 = vld [vmem:[%s6062_s3 + $0x28c] sm:$0xf0]  ;;  %v2879_v33 = vor.u32 %v3902_v25, %v2878_v23 }
  0x1b   :  { %1859 = vmatpush.bf16.msra.mxu2 %v3039_v14  ;;  %1873 = vmatpush.bf16.msra.mxu3 %v3167_v15  ;;  %v3134_v30 = vld [vmem:[%s6062_s3 + $0x380] sm:$0xf]  ;;  %v3966_v31 = vld [vmem:[%s6062_s3 + $0x38c] sm:$0xf0]  ;;  %v3007_v37 = vor.u32 %v3934_v29, %v3006_v28 }
  0x1c   :  { %v2734_v34 = vld [vmem:[%s6062_s3 + $0x60] sm:$0xf]  ;;  %v3866_v35 = vld [vmem:[%s6062_s3 + $0x6c] sm:$0xf0]  ;;  %2680 = vmatmul.msk.bf16.vlgmr.msrb.gmra.mxu0 %vm144_vm0, %v4235_v26  ;;  %v3135_v39 = vor.u32 %v3966_v31, %v3134_v30  ;;  %2681 = vmatmul.msk.bf16.vlgmr.msrb.gmra.mxu1 %vm144_vm0, %v4235_v26 }
  0x1d   :  { %1832 = vmatpush.bf16.msra.mxu0 %v2767_v13  ;;  %1846 = vmatpush.bf16.msra.mxu1 %v2895_v16  ;;  %v2862_v36 = vld [vmem:[%s6062_s3 + $0x160] sm:$0xf]  ;;  %v3898_v38 = vld [vmem:[%s6062_s3 + $0x16c] sm:$0xf0]  ;;  %v2735_v44 = vor.u32 %v3866_v35, %v2734_v34 }
  0x1e   :  { %v2990_v40 = vld [vmem:[%s6062_s3 + $0x260] sm:$0xf]  ;;  %v3930_v41 = vld [vmem:[%s6062_s3 + $0x26c] sm:$0xf0]  ;;  %2682 = vmatmul.msk.bf16.vlgmr.msrb.gmra.mxu2 %vm144_vm0, %v4235_v26  ;;  %2683 = vmatmul.msk.bf16.vlgmr.msrb.gmra.mxu3 %vm144_vm0, %v4235_v26  ;;  %v2863_v45 = vor.u32 %v3898_v38, %v2862_v36 }
  0x1f   :  { %1860 = vmatpush.bf16.msra.mxu2 %v3023_v24  ;;  %1874 = vmatpush.bf16.msra.mxu3 %v3151_v27  ;;  %v3118_v42 = vld [vmem:[%s6062_s3 + $0x360] sm:$0xf]  ;;  %v3962_v43 = vld [vmem:[%s6062_s3 + $0x36c] sm:$0xf0]  ;;  %v2991_v49 = vor.u32 %v3930_v41, %v2990_v40 }
  0x20   :  { %v2718_v46 = vld [vmem:[%s6062_s3 + $0x40] sm:$0xf]  ;;  %v3862_v47 = vld [vmem:[%s6062_s3 + $0x4c] sm:$0xf0]  ;;  %v3119_v50 = vor.u32 %v3962_v43, %v3118_v42 }
  0x21   :  { %1833 = vmatpush.bf16.msra.mxu0 %v2751_v32  ;;  %1847 = vmatpush.bf16.msra.mxu1 %v2879_v33  ;;  %v2846_v48 = vld [vmem:[%s6062_s3 + $0x140] sm:$0xf]  ;;  %v3894_v26 = vld [vmem:[%s6062_s3 + $0x14c] sm:$0xf0]  ;;  %v2719_v55 = vor.u32 %v3862_v47, %v2718_v46 }
  0x22   :  { %v2974_v51 = vld [vmem:[%s6062_s3 + $0x240] sm:$0xf]  ;;  %v3926_v52 = vld [vmem:[%s6062_s3 + $0x24c] sm:$0xf0]  ;;  %v2847_v56 = vor.u32 %v3894_v26, %v2846_v48 }
  0x23   :  { %1861 = vmatpush.bf16.msra.mxu2 %v3007_v37  ;;  %1875 = vmatpush.bf16.msra.mxu3 %v3135_v39  ;;  %v3102_v53 = vld [vmem:[%s6062_s3 + $0x340] sm:$0xf]  ;;  %v3958_v54 = vld [vmem:[%s6062_s3 + $0x34c] sm:$0xf0]  ;;  %v2975_v60 = vor.u32 %v3926_v52, %v2974_v51 }
  0x24   :  { %v2702_v57 = vld [vmem:[%s6062_s3 + $0x20] sm:$0xf]  ;;  %v3858_v58 = vld [vmem:[%s6062_s3 + $0x2c] sm:$0xf0]  ;;  %v3103_v62 = vor.u32 %v3958_v54, %v3102_v53 }
  0x25   :  { %1834 = vmatpush.bf16.msra.mxu0 %v2735_v44  ;;  %1848 = vmatpush.bf16.msra.mxu1 %v2863_v45  ;;  %v2830_v59 = vld [vmem:[%s6062_s3 + $0x120] sm:$0xf]  ;;  %v3890_v61 = vld [vmem:[%s6062_s3 + $0x12c] sm:$0xf0]  ;;  %v2703_v3 = vor.u32 %v3858_v58, %v2702_v57 }
  0x26   :  { %v2958_v63 = vld [vmem:[%s6062_s3 + $0x220] sm:$0xf]  ;;  %v3922_v0 = vld [vmem:[%s6062_s3 + $0x22c] sm:$0xf0]  ;;  %v2831_v6 = vor.u32 %v3890_v61, %v2830_v59 }
  0x27   :  { %1862 = vmatpush.bf16.msra.mxu2 %v2991_v49  ;;  %1876 = vmatpush.bf16.msra.mxu3 %v3119_v50  ;;  %v3086_v1 = vld [vmem:[%s6062_s3 + $0x320] sm:$0xf]  ;;  %v3954_v2 = vld [vmem:[%s6062_s3 + $0x32c] sm:$0xf0]  ;;  %v2959_v10 = vor.u32 %v3922_v0, %v2958_v63 }
  0x28   :  { %v2686_v4 = vld [vmem:[%s6062_s3] sm:$0xf]  ;;  %v3854_v5 = vld [vmem:[%s6062_s3 + $0xc] sm:$0xf0]  ;;  %v3087_v14 = vor.u32 %v3954_v2, %v3086_v1 }
  0x29   :  { %1835 = vmatpush.bf16.msra.mxu0 %v2719_v55  ;;  %1849 = vmatpush.bf16.msra.mxu1 %v2847_v56  ;;  %v2814_v7 = vld [vmem:[%s6062_s3 + $0x100] sm:$0xf]  ;;  %v3886_v8 = vld [vmem:[%s6062_s3 + $0x10c] sm:$0xf0]  ;;  %v2687_v18 = vor.u32 %v3854_v5, %v2686_v4 }
  0x2a   :  { %v3310_v9 = vld [vmem:[%s6062_s3 + $0x4e0] sm:$0xf]  ;;  %v4010_v11 = vld [vmem:[%s6062_s3 + $0x4ec] sm:$0xf0]  ;;  %v2815_v22 = vor.u32 %v3886_v8, %v2814_v7 }
  0x2b   :  { %1863 = vmatpush.bf16.msra.mxu2 %v2975_v60  ;;  %1877 = vmatpush.bf16.msra.mxu3 %v3103_v62  ;;  %v3438_v12 = vld [vmem:[%s6062_s3 + $0x5e0] sm:$0xf]  ;;  %v4042_v13 = vld [vmem:[%s6062_s3 + $0x5ec] sm:$0xf0]  ;;  %v3311_v23 = vor.u32 %v4010_v11, %v3310_v9 }
  0x2c   :  { %v2942_v15 = vld [vmem:[%s6062_s3 + $0x200] sm:$0xf]  ;;  %v3918_v16 = vld [vmem:[%s6062_s3 + $0x20c] sm:$0xf0]  ;;  %v3439_v27 = vor.u32 %v4042_v13, %v3438_v12 }
  0x2d   :  { %v3070_v17 = vld [vmem:[%s6062_s3 + $0x300] sm:$0xf]  ;;  %1836 = vmatpush.bf16.msra.mxu0 %v2703_v3  ;;  %v3950_v19 = vld [vmem:[%s6062_s3 + $0x30c] sm:$0xf0]  ;;  %1850 = vmatpush.bf16.msra.mxu1 %v2831_v6  ;;  %v2943_v30 = vor.u32 %v3918_v16, %v2942_v15 }
  0x2e   :  { %v3566_v20 = vld [vmem:[%s6062_s3 + $0x6e0] sm:$0xf]  ;;  %v4074_v21 = vld [vmem:[%s6062_s3 + $0x6ec] sm:$0xf0]  ;;  %v3071_v33 = vor.u32 %v3950_v19, %v3070_v17 }
  0x2f   :  { %1864 = vmatpush.bf16.msra.mxu2 %v2959_v10  ;;  %v3694_v24 = vld [vmem:[%s6062_s3 + $0x7e0] sm:$0xf]  ;;  %v4106_v25 = vld [vmem:[%s6062_s3 + $0x7ec] sm:$0xf0]  ;;  %1878 = vmatpush.bf16.msra.mxu3 %v3087_v14  ;;  %v3567_v34 = vor.u32 %v4074_v21, %v3566_v20 }
  0x30   :  { %v3294_v28 = vld [vmem:[%s6062_s3 + $0x4c0] sm:$0xf]  ;;  %v4006_v29 = vld [vmem:[%s6062_s3 + $0x4cc] sm:$0xf0]  ;;  %v3695_v35 = vor.u32 %v4106_v25, %v3694_v24 }
  0x31   :  { %v3422_v31 = vld [vmem:[%s6062_s3 + $0x5c0] sm:$0xf]  ;;  %v4038_v32 = vld [vmem:[%s6062_s3 + $0x5cc] sm:$0xf0]  ;;  %1837 = vmatpush.bf16.msra.mxu0 %v2687_v18  ;;  %1851 = vmatpush.bf16.msra.mxu1 %v2815_v22  ;;  %v3295_v38 = vor.u32 %v4006_v29, %v3294_v28 }
  0x32   :  { %v3550_v36 = vld [vmem:[%s6062_s3 + $0x6c0] sm:$0xf]  ;;  %v4070_v37 = vld [vmem:[%s6062_s3 + $0x6cc] sm:$0xf0]  ;;  %v3423_v41 = vor.u32 %v4038_v32, %v3422_v31 }
  0x33   :  { %v3678_v39 = vld [vmem:[%s6062_s3 + $0x7c0] sm:$0xf]  ;;  %v4102_v40 = vld [vmem:[%s6062_s3 + $0x7cc] sm:$0xf0]  ;;  %1865 = vmatpush.bf16.msra.mxu2 %v2943_v30  ;;  %1879 = vmatpush.bf16.msra.mxu3 %v3071_v33  ;;  %v3551_v46 = vor.u32 %v4070_v37, %v3550_v36 }
  0x34   :  { %v3278_v42 = vld [vmem:[%s6062_s3 + $0x4a0] sm:$0xf]  ;;  %v4002_v43 = vld [vmem:[%s6062_s3 + $0x4ac] sm:$0xf0]  ;;  %v3679_v47 = vor.u32 %v4102_v40, %v3678_v39 }
  0x35   :  { %1886 = vmatpush.bf16.msrb.mxu0 %v3311_v23  ;;  %1900 = vmatpush.bf16.msrb.mxu1 %v3439_v27  ;;  %v3406_v44 = vld [vmem:[%s6062_s3 + $0x5a0] sm:$0xf]  ;;  %v4034_v45 = vld [vmem:[%s6062_s3 + $0x5ac] sm:$0xf0]  ;;  %v3279_v48 = vor.u32 %v4002_v43, %v3278_v42 }
  0x36   :  { %v3407_v49 = vor.u32 %v4034_v45, %v3406_v44  ;;  %v3262_v26 = vld [vmem:[%s6062_s3 + $0x480] sm:$0xf]  ;;  %v3998_v50 = vld [vmem:[%s6062_s3 + $0x48c] sm:$0xf0] }
  0x37   :  { %1914 = vmatpush.bf16.msrb.mxu2 %v3567_v34  ;;  %1928 = vmatpush.bf16.msrb.mxu3 %v3695_v35  ;;  %v3390_v51 = vld [vmem:[%s6062_s3 + $0x580] sm:$0xf]  ;;  %v4030_v52 = vld [vmem:[%s6062_s3 + $0x58c] sm:$0xf0]  ;;  %v3263_v53 = vor.u32 %v3998_v50, %v3262_v26 }
  0x38   :  { %v3391_v54 = vor.u32 %v4030_v52, %v3390_v51  ;;  %v3534_v55 = vld [vmem:[%s6062_s3 + $0x6a0] sm:$0xf]  ;;  %v4066_v56 = vld [vmem:[%s6062_s3 + $0x6ac] sm:$0xf0] }
  0x39   :  { %1887 = vmatpush.bf16.msrb.mxu0 %v3295_v38  ;;  %1901 = vmatpush.bf16.msrb.mxu1 %v3423_v41  ;;  %v3662_v57 = vld [vmem:[%s6062_s3 + $0x7a0] sm:$0xf]  ;;  %v3535_v58 = vor.u32 %v4066_v56, %v3534_v55  ;;  %v4098_v59 = vld [vmem:[%s6062_s3 + $0x7ac] sm:$0xf0] }
  0x3a   :  { %v3663_v60 = vor.u32 %v4098_v59, %v3662_v57  ;;  %v3246_v61 = vld [vmem:[%s6062_s3 + $0x460] sm:$0xf]  ;;  %v3994_v62 = vld [vmem:[%s6062_s3 + $0x46c] sm:$0xf0] }
  0x3b   :  { %1915 = vmatpush.bf16.msrb.mxu2 %v3551_v46  ;;  %1929 = vmatpush.bf16.msrb.mxu3 %v3679_v47  ;;  %v3374_v63 = vld [vmem:[%s6062_s3 + $0x560] sm:$0xf]  ;;  %v3247_v0 = vor.u32 %v3994_v62, %v3246_v61  ;;  %v4026_v1 = vld [vmem:[%s6062_s3 + $0x56c] sm:$0xf0] }
  0x3c   :  { %v3375_v2 = vor.u32 %v4026_v1, %v3374_v63  ;;  %v3518_v3 = vld [vmem:[%s6062_s3 + $0x680] sm:$0xf]  ;;  %v4062_v4 = vld [vmem:[%s6062_s3 + $0x68c] sm:$0xf0]  ;;  %v2800_v1 = vld [vmem:[%s6062_s3 + $0xf0] sm:$0xf0] }
  0x3d   :  { %1888 = vmatpush.bf16.msrb.mxu0 %v3279_v48  ;;  %1902 = vmatpush.bf16.msrb.mxu1 %v3407_v49  ;;  %v3519_v5 = vor.u32 %v4062_v4, %v3518_v3  ;;  %v3646_v6 = vld [vmem:[%s6062_s3 + $0x780] sm:$0xf]  ;;  %v4094_v7 = vld [vmem:[%s6062_s3 + $0x78c] sm:$0xf0] }
  0x3e   :  { %v3647_v8 = vor.u32 %v4094_v7, %v3646_v6  ;;  %v3230_v9 = vld [vmem:[%s6062_s3 + $0x440] sm:$0xf]  ;;  %v3990_v10 = vld [vmem:[%s6062_s3 + $0x44c] sm:$0xf0]  ;;  %v2928_v6 = vld [vmem:[%s6062_s3 + $0x1f0] sm:$0xf0] }
  0x3f   :  { %1916 = vmatpush.bf16.msrb.mxu2 %v3535_v58  ;;  %1930 = vmatpush.bf16.msrb.mxu3 %v3663_v60  ;;  %v3358_v11 = vld [vmem:[%s6062_s3 + $0x540] sm:$0xf]  ;;  %v3231_v12 = vor.u32 %v3990_v10, %v3230_v9  ;;  %v4022_v13 = vld [vmem:[%s6062_s3 + $0x54c] sm:$0xf0] }
  0x40   :  { %v3359_v14 = vor.u32 %v4022_v13, %v3358_v11  ;;  %v3502_v15 = vld [vmem:[%s6062_s3 + $0x660] sm:$0xf]  ;;  %v4058_v16 = vld [vmem:[%s6062_s3 + $0x66c] sm:$0xf0]  ;;  %v3876_v13 = vld [vmem:[%s6062_s3 + $0xc4] sm:$0xf] }
  0x41   :  { %1889 = vmatpush.bf16.msrb.mxu0 %v3263_v53  ;;  %1903 = vmatpush.bf16.msrb.mxu1 %v3391_v54  ;;  %v3630_v17 = vld [vmem:[%s6062_s3 + $0x760] sm:$0xf]  ;;  %v3503_v18 = vor.u32 %v4058_v16, %v3502_v15  ;;  %v4090_v19 = vld [vmem:[%s6062_s3 + $0x76c] sm:$0xf0] }
  0x42   :  { %v3631_v20 = vor.u32 %v4090_v19, %v3630_v17  ;;  %v3214_v21 = vld [vmem:[%s6062_s3 + $0x420] sm:$0xf]  ;;  %v3986_v22 = vld [vmem:[%s6062_s3 + $0x42c] sm:$0xf0]  ;;  %v3908_v17 = vld [vmem:[%s6062_s3 + $0x1c4] sm:$0xf] }
  0x43   :  { %1917 = vmatpush.bf16.msrb.mxu2 %v3519_v5  ;;  %1931 = vmatpush.bf16.msrb.mxu3 %v3647_v8  ;;  %v3215_v23 = vor.u32 %v3986_v22, %v3214_v21  ;;  %v3342_v24 = vld [vmem:[%s6062_s3 + $0x520] sm:$0xf]  ;;  %v4018_v25 = vld [vmem:[%s6062_s3 + $0x52c] sm:$0xf0]  ;;  %v3912_v5 = vld [vmem:[%s6062_s3 + $0x1e4] sm:$0xf] }
  0x44   :  { %v3343_v27 = vor.u32 %v4018_v25, %v3342_v24  ;;  %v3486_v28 = vld [vmem:[%s6062_s3 + $0x640] sm:$0xf]  ;;  %v4054_v29 = vld [vmem:[%s6062_s3 + $0x64c] sm:$0xf0]  ;;  %v3944_v21 = vld [vmem:[%s6062_s3 + $0x2e4] sm:$0xf] }
  0x45   :  { %1890 = vmatpush.bf16.msrb.mxu0 %v3247_v0  ;;  %1904 = vmatpush.bf16.msrb.mxu1 %v3375_v2  ;;  %v3614_v30 = vld [vmem:[%s6062_s3 + $0x740] sm:$0xf]  ;;  %v3487_v31 = vor.u32 %v4054_v29, %v3486_v28  ;;  %v4086_v32 = vld [vmem:[%s6062_s3 + $0x74c] sm:$0xf0]  ;;  %v3880_v0 = vld [vmem:[%s6062_s3 + $0xe4] sm:$0xf] }
  0x46   :  { %v3615_v33 = vor.u32 %v4086_v32, %v3614_v30  ;;  %v3198_v34 = vld [vmem:[%s6062_s3 + $0x400] sm:$0xf]  ;;  %v3982_v35 = vld [vmem:[%s6062_s3 + $0x40c] sm:$0xf0]  ;;  %v2803_v10 = vor.u32 %v3880_v0, %v2800_v1  ;;  %v3056_v29 = vld [vmem:[%s6062_s3 + $0x2f0] sm:$0xf0] }
  0x47   :  { %1918 = vmatpush.bf16.msrb.mxu2 %v3503_v18  ;;  %1932 = vmatpush.bf16.msrb.mxu3 %v3631_v20  ;;  %v3326_v36 = vld [vmem:[%s6062_s3 + $0x500] sm:$0xf]  ;;  %v3199_v37 = vor.u32 %v3982_v35, %v3198_v34  ;;  %v4014_v38 = vld [vmem:[%s6062_s3 + $0x50c] sm:$0xf0]  ;;  %v2912_v18 = vld [vmem:[%s6062_s3 + $0x1d0] sm:$0xf0] }
  0x48   :  { %v3327_v39 = vor.u32 %v4014_v38, %v3326_v36  ;;  %v3470_v40 = vld [vmem:[%s6062_s3 + $0x620] sm:$0xf]  ;;  %v4050_v41 = vld [vmem:[%s6062_s3 + $0x62c] sm:$0xf0]  ;;  %v3976_v30 = vld [vmem:[%s6062_s3 + $0x3e4] sm:$0xf] }
  0x49   :  { %1891 = vmatpush.bf16.msrb.mxu0 %v3231_v12  ;;  %1905 = vmatpush.bf16.msrb.mxu1 %v3359_v14  ;;  %v3598_v42 = vld [vmem:[%s6062_s3 + $0x720] sm:$0xf]  ;;  %v4082_v43 = vld [vmem:[%s6062_s3 + $0x72c] sm:$0xf0]  ;;  %v3471_v44 = vor.u32 %v4050_v41, %v3470_v40  ;;  %v2931_v12 = vor.u32 %v3912_v5, %v2928_v6  ;;  %v2784_v14 = vld [vmem:[%s6062_s3 + $0xd0] sm:$0xf0] }
  0x4a   :  { %v3599_v45 = vor.u32 %v4082_v43, %v3598_v42  ;;  %v3454_v46 = vld [vmem:[%s6062_s3 + $0x600] sm:$0xf]  ;;  %v4046_v47 = vld [vmem:[%s6062_s3 + $0x60c] sm:$0xf0]  ;;  %v2787_v28 = vor.u32 %v3876_v13, %v2784_v14  ;;  %v3184_v34 = vld [vmem:[%s6062_s3 + $0x3f0] sm:$0xf0]  ;;  %v3059_v43 = vor.u32 %v3944_v21, %v3056_v29 }
  0x4b   :  { %1919 = vmatpush.bf16.msrb.mxu2 %v3487_v31  ;;  %1933 = vmatpush.bf16.msrb.mxu3 %v3615_v33  ;;  %v3455_v48 = vor.u32 %v4046_v47, %v3454_v46  ;;  %v3582_v49 = vld [vmem:[%s6062_s3 + $0x700] sm:$0xf]  ;;  %v4078_v26 = vld [vmem:[%s6062_s3 + $0x70c] sm:$0xf0]  ;;  %v2915_v33 = vor.u32 %v3908_v17, %v2912_v18  ;;  %v3872_v35 = vld [vmem:[%s6062_s3 + $0xa4] sm:$0xf] }
  0x4c   :  { %v3583_v50 = vor.u32 %v4078_v26, %v3582_v49  ;;  %v4688_v51 = vld [vmem:[%s6063_s2] sm:$0xff]  ;;  %v2768_v36 = vld [vmem:[%s6062_s3 + $0xb0] sm:$0xf0] }
  0x4d   :  { %1892 = vmatpush.bf16.msrb.mxu0 %v3215_v23  ;;  %1906 = vmatpush.bf16.msrb.mxu1 %v3343_v27  ;;  %v48_v53 = vperm.slane %v4688_v51, 0  ;;  %v49_v55 = vperm.slane %v4688_v51, 1  ;;  %v50_v3 = vperm.slane %v4688_v51, 2  ;;  %v51_v7 = vperm.slane %v4688_v51, 3  ;;  %v2896_v40 = vld [vmem:[%s6062_s3 + $0x1b0] sm:$0xf0] }
  0x4e   :  { %v52_v24 = vperm.slane %v4688_v51, 4  ;;  %v53_v27 = vperm.slane %v4688_v51, 5  ;;  %v2771_v46 = vor.u32 %v3872_v35, %v2768_v36  ;;  %v3940_v47 = vld [vmem:[%s6062_s3 + $0x2c4] sm:$0xf]  ;;  %v3152_v5 = vld [vmem:[%s6062_s3 + $0x3b0] sm:$0xf0] }
  0x4f   :  { %1920 = vmatpush.bf16.msrb.mxu2 %v3471_v44  ;;  %1934 = vmatpush.bf16.msrb.mxu3 %v3599_v45  ;;  %v3187_v45 = vor.u32 %v3976_v30, %v3184_v34  ;;  %v3972_v49 = vld [vmem:[%s6062_s3 + $0x3c4] sm:$0xf]  ;;  %v2736_v13 = vld [vmem:[%s6062_s3 + $0x70] sm:$0xf0] }
  0x50   :  { %v3896_v17 = vld [vmem:[%s6062_s3 + $0x164] sm:$0xf]  ;;  %v2720_v34 = vld [vmem:[%s6062_s3 + $0x50] sm:$0xf0] }
  0x51   :  { %1893 = vmatpush.bf16.msrb.mxu0 %v3199_v37  ;;  %1907 = vmatpush.bf16.msrb.mxu1 %v3327_v39  ;;  %v3904_v39 = vld [vmem:[%s6062_s3 + $0x1a4] sm:$0xf]  ;;  %v2848_v36 = vld [vmem:[%s6062_s3 + $0x150] sm:$0xf0] }
  0x52   :  { %v3964_v30 = vld [vmem:[%s6062_s3 + $0x384] sm:$0xf] }
  0x53   :  { %1921 = vmatpush.bf16.msrb.mxu2 %v3455_v48  ;;  %1935 = vmatpush.bf16.msrb.mxu3 %v3583_v50  ;;  %v3040_v48 = vld [vmem:[%s6062_s3 + $0x2d0] sm:$0xf0]  ;;  %v3892_v35 = vld [vmem:[%s6062_s3 + $0x144] sm:$0xf] }
  0x89   :  { %v157_v52 = vpop.f32.mrf.mxu0  ;;  %v171_v54 = vpop.f32.mrf.mxu1 }
  0x8a   :  { %v158_v56 = vadd.f32 %v157_v52, %v48_v53  ;;  %v172_v57 = vadd.f32 %v171_v54, %v49_v55  ;;  %v2899_v52 = vor.u32 %v3904_v39, %v2896_v40  ;;  %v3868_v54 = vld [vmem:[%s6062_s3 + $0x84] sm:$0xf]  ;;  %v2992_v40 = vld [vmem:[%s6062_s3 + $0x270] sm:$0xf0] }
  0x8b   :  { %v3928_v39 = vld [vmem:[%s6062_s3 + $0x264] sm:$0xf] }
  0x8c   :  { %v260_v61 = vmax.f32 %v158_v56, 0.0  ;;  %v261_v2 = vmax.f32 %v172_v57, 0.0  ;;  %v3900_v57 = vld [vmem:[%s6062_s3 + $0x184] sm:$0xf] }
  0x91   :  { %v185_v58 = vpop.f32.mrf.mxu2  ;;  %v199_v59 = vpop.f32.mrf.mxu3 }
  0x92   :  { %v159_v60 = vpop.f32.mrf.mxu0  ;;  %v173_v63 = vpop.f32.mrf.mxu1  ;;  %v186_v15 = vadd.f32 %v185_v58, %v50_v3  ;;  %v200_v19 = vadd.f32 %v199_v59, %v51_v7  ;;  %v2880_v58 = vld [vmem:[%s6062_s3 + $0x190] sm:$0xf0]  ;;  %v54_v59 = vperm.slane %v4688_v51, 6 }
  0x93   :  { %v160_v62 = vadd.f32 %v159_v60, %v48_v53  ;;  %v174_v4 = vadd.f32 %v173_v63, %v49_v55  ;;  %v3168_v53 = vld [vmem:[%s6062_s3 + $0x3d0] sm:$0xf0] }
  0x94   :  { %v262_v37 = vmax.f32 %v186_v15, 0.0  ;;  %v263_v41 = vmax.f32 %v200_v19, 0.0  ;;  %v2752_v55 = vld [vmem:[%s6062_s3 + $0x90] sm:$0xf0]  ;;  %v3171_v1 = vor.u32 %v3972_v49, %v3168_v53  ;;  %v3856_v53 = vld [vmem:[%s6062_s3 + $0x24] sm:$0xf] }
  0x95   :  { %v268_v8 = vmax.f32 %v160_v62, 0.0  ;;  %v269_v9 = vmax.f32 %v174_v4, 0.0  ;;  %v3936_v62 = vld [vmem:[%s6062_s3 + $0x2a4] sm:$0xf] }
  0x96   :  { %v3968_v4 = vld [vmem:[%s6062_s3 + $0x3a4] sm:$0xf] }
  0x97   :  { %v4706_v11 = vpack.c.bf16 %v268_v8, %v260_v61  ;;  %v4714_v16 = vpack.c.bf16 %v269_v9, %v261_v2  ;;  %v3043_v61 = vor.u32 %v3940_v47, %v3040_v48  ;;  %v2755_v2 = vor.u32 %v3868_v54, %v2752_v55  ;;  %v3120_v47 = vld [vmem:[%s6062_s3 + $0x370] sm:$0xf0] }
  0x98   :  { %v2704_v54 = vld [vmem:[%s6062_s3 + $0x30] sm:$0xf0] }
  0x99   :  { %v187_v20 = vpop.f32.mrf.mxu2  ;;  %1838 = vmatmul.bf16.vlgmr.msra.gmra.mxu0 %v4706_v11  ;;  %v201_v23 = vpop.f32.mrf.mxu3  ;;  %1852 = vmatmul.bf16.vlgmr.msra.gmra.mxu1 %v4714_v16 }
  0x9a   :  { %v188_v22 = vadd.f32 %v187_v20, %v50_v3  ;;  %1942 = vmatpush.bf16.msra.mxu0 %v2803_v10  ;;  %v213_v25 = vpop.f32.mrf.mxu0  ;;  %v202_v31 = vadd.f32 %v201_v23, %v51_v7  ;;  %1956 = vmatpush.bf16.msra.mxu1 %v2931_v12  ;;  %v227_v32 = vpop.f32.mrf.mxu1  ;;  %v3024_v3 = vld [vmem:[%s6062_s3 + $0x2b0] sm:$0xf0]  ;;  %v55_v7 = vperm.slane %v4688_v51, 7  ;;  %v2883_v10 = vor.u32 %v3900_v57, %v2880_v58  ;;  %v3864_v12 = vld [vmem:[%s6062_s3 + $0x64] sm:$0xf] }
  0x9b   :  { %v214_v50 = vadd.f32 %v213_v25, %v52_v24  ;;  %v228_v56 = vadd.f32 %v227_v32, %v53_v27  ;;  %v2864_v51 = vld [vmem:[%s6062_s3 + $0x170] sm:$0xf0]  ;;  %v3027_v19 = vor.u32 %v3936_v62, %v3024_v3  ;;  %v3932_v23 = vld [vmem:[%s6062_s3 + $0x284] sm:$0xf] }
  0x9c   :  { %v270_v38 = vmax.f32 %v188_v22, 0.0  ;;  %v271_v42 = vmax.f32 %v202_v31, 0.0  ;;  %v3155_v22 = vor.u32 %v3968_v4, %v3152_v5  ;;  %v2867_v29 = vor.u32 %v3896_v17, %v2864_v51  ;;  %v3136_v31 = vld [vmem:[%s6062_s3 + $0x390] sm:$0xf0]  ;;  %v3860_v32 = vld [vmem:[%s6062_s3 + $0x44] sm:$0xf] }
  0x9d   :  { %v264_v6 = vmax.f32 %v214_v50, 0.0  ;;  %v265_v14 = vmax.f32 %v228_v56, 0.0  ;;  %v2723_v50 = vor.u32 %v3860_v32, %v2720_v34  ;;  %v3888_v56 = vld [vmem:[%s6062_s3 + $0x124] sm:$0xf]  ;;  %v2832_v57 = vld [vmem:[%s6062_s3 + $0x130] sm:$0xf0] }
  0x9e   :  { %v4750_v44 = vpack.c.bf16 %v270_v38, %v262_v37  ;;  %1943 = vmatpush.bf16.msra.mxu0 %v2787_v28  ;;  %v4761_v26 = vpack.c.bf16 %v271_v42, %v263_v41  ;;  %1957 = vmatpush.bf16.msra.mxu1 %v2915_v33  ;;  %v2739_v28 = vor.u32 %v3864_v12, %v2736_v13  ;;  %v3924_v62 = vld [vmem:[%s6062_s3 + $0x244] sm:$0xf]  ;;  %v3104_v4 = vld [vmem:[%s6062_s3 + $0x350] sm:$0xf0] }
  0x9f   :  { %v2835_v3 = vor.u32 %v3888_v56, %v2832_v57  ;;  %v3852_v5 = vld [vmem:[%s6062_s3 + $0x4] sm:$0xf]  ;;  %v3312_v12 = vld [vmem:[%s6062_s3 + $0x4f0] sm:$0xf0] }
  0xa0   :  { %1866 = vmatmul.bf16.vlgmr.msra.gmra.mxu2 %v4750_v44  ;;  %1880 = vmatmul.bf16.vlgmr.msra.gmra.mxu3 %v4761_v26  ;;  %v4040_v13 = vld [vmem:[%s6062_s3 + $0x5e4] sm:$0xf]  ;;  %v2960_v51 = vld [vmem:[%s6062_s3 + $0x230] sm:$0xf0] }
  0xa1   :  { %1970 = vmatpush.bf16.msra.mxu2 %v3059_v43  ;;  %v241_v60 = vpop.f32.mrf.mxu2  ;;  %1984 = vmatpush.bf16.msra.mxu3 %v3187_v45  ;;  %v255_v63 = vpop.f32.mrf.mxu3  ;;  %v3139_v45 = vor.u32 %v3964_v30, %v3136_v31  ;;  %v3920_v17 = vld [vmem:[%s6062_s3 + $0x224] sm:$0xf]  ;;  %v3424_v30 = vld [vmem:[%s6062_s3 + $0x5d0] sm:$0xf0] }
  0xa2   :  { %1944 = vmatpush.bf16.msra.mxu0 %v2771_v46  ;;  %v215_v0 = vpop.f32.mrf.mxu0  ;;  %1958 = vmatpush.bf16.msra.mxu1 %v2899_v52  ;;  %v229_v9 = vpop.f32.mrf.mxu1  ;;  %v242_v20 = vadd.f32 %v241_v60, %v54_v59  ;;  %v256_v25 = vadd.f32 %v255_v63, %v55_v7  ;;  %v3960_v46 = vld [vmem:[%s6062_s3 + $0x364] sm:$0xf]  ;;  %v2851_v52 = vor.u32 %v3892_v35, %v2848_v36  ;;  %v2976_v63 = vld [vmem:[%s6062_s3 + $0x250] sm:$0xf0] }
  0xa3   :  { %v216_v8 = vadd.f32 %v215_v0, %v52_v24  ;;  %v230_v15 = vadd.f32 %v229_v9, %v53_v27  ;;  %v3008_v24 = vld [vmem:[%s6062_s3 + $0x290] sm:$0xf0]  ;;  %v3956_v0 = vld [vmem:[%s6062_s3 + $0x344] sm:$0xf] }
  0xa4   :  { %v3011_v38 = vor.u32 %v3932_v23, %v3008_v24  ;;  %v266_v41 = vmax.f32 %v242_v20, 0.0  ;;  %v267_v48 = vmax.f32 %v256_v25, 0.0  ;;  %v4008_v9 = vld [vmem:[%s6062_s3 + $0x4e4] sm:$0xf]  ;;  %v2963_v25 = vor.u32 %v3920_v17, %v2960_v51  ;;  %v2944_v34 = vld [vmem:[%s6062_s3 + $0x210] sm:$0xf0] }
  0xa5   :  { %v272_v18 = vmax.f32 %v216_v8, 0.0  ;;  %1971 = vmatpush.bf16.msra.mxu2 %v3043_v61  ;;  %v273_v21 = vmax.f32 %v230_v15, 0.0  ;;  %1985 = vmatpush.bf16.msra.mxu3 %v3171_v1  ;;  %v3123_v61 = vor.u32 %v3960_v46, %v3120_v47  ;;  %v2816_v8 = vld [vmem:[%s6062_s3 + $0x110] sm:$0xf0]  ;;  %v3107_v15 = vor.u32 %v3956_v0, %v3104_v4  ;;  %v3952_v20 = vld [vmem:[%s6062_s3 + $0x324] sm:$0xf] }
  0xa6   :  { %1945 = vmatpush.bf16.msra.mxu0 %v2755_v2  ;;  %1959 = vmatpush.bf16.msra.mxu1 %v2883_v10  ;;  %v2707_v2 = vor.u32 %v3856_v53, %v2704_v54  ;;  %v2979_v10 = vor.u32 %v3924_v62, %v2976_v63  ;;  %v4004_v24 = vld [vmem:[%s6062_s3 + $0x4c4] sm:$0xf]  ;;  %v3072_v36 = vld [vmem:[%s6062_s3 + $0x310] sm:$0xf0] }
  0xa7   :  { %v4812_v27 = vpack.c.bf16 %v272_v18, %v264_v6  ;;  %v4823_v33 = vpack.c.bf16 %v273_v21, %v265_v14  ;;  %v2688_v6 = vld [vmem:[%s6062_s3 + $0x10] sm:$0xf0]  ;;  %v3916_v32 = vld [vmem:[%s6062_s3 + $0x204] sm:$0xf] }
  0xa8   :  { %v3440_v14 = vld [vmem:[%s6062_s3 + $0x5f0] sm:$0xf0]  ;;  %v2691_v18 = vor.u32 %v3852_v5, %v2688_v6  ;;  %v3948_v35 = vld [vmem:[%s6062_s3 + $0x304] sm:$0xf] }
  0xa9   :  { %1972 = vmatpush.bf16.msra.mxu2 %v3027_v19  ;;  %v243_v37 = vpop.f32.mrf.mxu2  ;;  %1894 = vmatmul.bf16.vlgmr.msrb.gmra.mxu0 %v4812_v27  ;;  %v257_v43 = vpop.f32.mrf.mxu3  ;;  %v3088_v21 = vld [vmem:[%s6062_s3 + $0x330] sm:$0xf0]  ;;  %v3443_v23 = vor.u32 %v4040_v13, %v3440_v14  ;;  %v4032_v47 = vld [vmem:[%s6062_s3 + $0x5a4] sm:$0xf] }
  0xaa   :  { %1986 = vmatpush.bf16.msra.mxu3 %v3155_v22  ;;  %v244_v42 = vadd.f32 %v243_v37, %v54_v59  ;;  %1908 = vmatmul.bf16.vlgmr.msrb.gmra.mxu1 %v4823_v33  ;;  %v258_v49 = vadd.f32 %v257_v43, %v55_v7  ;;  %v2995_v59 = vor.u32 %v3928_v39, %v2992_v40  ;;  %v3884_v7 = vld [vmem:[%s6062_s3 + $0x104] sm:$0xf]  ;;  %v3280_v46 = vld [vmem:[%s6062_s3 + $0x4b0] sm:$0xf0] }
  0xab   :  { %1946 = vmatpush.bf16.msra.mxu0 %v2739_v28  ;;  %1960 = vmatpush.bf16.msra.mxu1 %v2867_v29  ;;  %v2819_v19 = vor.u32 %v3884_v7, %v2816_v8  ;;  %v3315_v22 = vor.u32 %v4008_v9, %v3312_v12  ;;  %v3296_v28 = vld [vmem:[%s6062_s3 + $0x4d0] sm:$0xf0]  ;;  %v4036_v29 = vld [vmem:[%s6062_s3 + $0x5c4] sm:$0xf]  ;;  %v3091_v31 = vor.u32 %v3952_v20, %v3088_v21 }
  0xac   :  { %v274_v55 = vmax.f32 %v244_v42, 0.0  ;;  %v275_v58 = vmax.f32 %v258_v49, 0.0  ;;  %v4072_v37 = vld [vmem:[%s6062_s3 + $0x6e4] sm:$0xf]  ;;  %v3299_v39 = vor.u32 %v4004_v24, %v3296_v28  ;;  %v3427_v40 = vor.u32 %v4036_v29, %v3424_v30  ;;  %v3696_v42 = vld [vmem:[%s6062_s3 + $0x7f0] sm:$0xf0] }
  0xad   :  { %1973 = vmatpush.bf16.msra.mxu2 %v3011_v38  ;;  %v3568_v38 = vld [vmem:[%s6062_s3 + $0x6f0] sm:$0xf0]  ;;  %v4000_v43 = vld [vmem:[%s6062_s3 + $0x4a4] sm:$0xf]  ;;  %v3075_v49 = vor.u32 %v3948_v35, %v3072_v36 }
  0xae   :  { %v4860_v60 = vpack.c.bf16 %v274_v55, %v266_v41  ;;  %1987 = vmatpush.bf16.msra.mxu3 %v3139_v45  ;;  %v4871_v1 = vpack.c.bf16 %v275_v58, %v267_v48  ;;  %v4104_v41 = vld [vmem:[%s6062_s3 + $0x7e4] sm:$0xf]  ;;  %v2947_v45 = vor.u32 %v3916_v32, %v2944_v34  ;;  %v3408_v48 = vld [vmem:[%s6062_s3 + $0x5b0] sm:$0xf0]  ;;  %v3283_v55 = vor.u32 %v4000_v43, %v3280_v46 }
  0xaf   :  { %1947 = vmatpush.bf16.msra.mxu0 %v2723_v50  ;;  %1961 = vmatpush.bf16.msra.mxu1 %v2851_v52  ;;  %v3571_v50 = vor.u32 %v4072_v37, %v3568_v38  ;;  %v3699_v52 = vor.u32 %v4104_v41, %v3696_v42  ;;  %v4068_v53 = vld [vmem:[%s6062_s3 + $0x6c4] sm:$0xf]  ;;  %v3552_v54 = vld [vmem:[%s6062_s3 + $0x6d0] sm:$0xf0]  ;;  %v3411_v56 = vor.u32 %v4032_v47, %v3408_v48 }
  0xb0   :  { %1922 = vmatmul.bf16.vlgmr.msrb.gmra.mxu2 %v4860_v60  ;;  %1936 = vmatmul.bf16.vlgmr.msrb.gmra.mxu3 %v4871_v1  ;;  %v4100_v57 = vld [vmem:[%s6062_s3 + $0x7c4] sm:$0xf]  ;;  %v3680_v58 = vld [vmem:[%s6062_s3 + $0x7d0] sm:$0xf0]  ;;  %v3555_v0 = vor.u32 %v4068_v53, %v3552_v54 }
  0xb1   :  { %1974 = vmatpush.bf16.msra.mxu2 %v2995_v59  ;;  %v3996_v59 = vld [vmem:[%s6062_s3 + $0x484] sm:$0xf]  ;;  %v3392_v63 = vld [vmem:[%s6062_s3 + $0x590] sm:$0xf0] }
  0xb2   :  { %1988 = vmatpush.bf16.msra.mxu3 %v3123_v61  ;;  %v3264_v61 = vld [vmem:[%s6062_s3 + $0x490] sm:$0xf0]  ;;  %v4028_v62 = vld [vmem:[%s6062_s3 + $0x584] sm:$0xf] }
  0xb3   :  { %1948 = vmatpush.bf16.msra.mxu0 %v2707_v2  ;;  %1962 = vmatpush.bf16.msra.mxu1 %v2835_v3  ;;  %v3683_v2 = vor.u32 %v4100_v57, %v3680_v58  ;;  %v4064_v3 = vld [vmem:[%s6062_s3 + $0x6a4] sm:$0xf]  ;;  %v3536_v4 = vld [vmem:[%s6062_s3 + $0x6b0] sm:$0xf0]  ;;  %v3267_v5 = vor.u32 %v3996_v59, %v3264_v61  ;;  %v3395_v6 = vor.u32 %v4028_v62, %v3392_v63  ;;  %v3883_v57 = vld [vmem:[%s6062_s3 + $0xf4] sm:$0xf0] }
  0xb4   :  { %v4096_v7 = vld [vmem:[%s6062_s3 + $0x7a4] sm:$0xf]  ;;  %v3664_v8 = vld [vmem:[%s6062_s3 + $0x7b0] sm:$0xf0]  ;;  %v3539_v14 = vor.u32 %v4064_v3, %v3536_v4  ;;  %v2934_v58 = vld [vmem:[%s6062_s3 + $0x1e8] sm:$0xf] }
  0xb5   :  { %1975 = vmatpush.bf16.msra.mxu2 %v2979_v10  ;;  %v3992_v9 = vld [vmem:[%s6062_s3 + $0x464] sm:$0xf]  ;;  %v3248_v10 = vld [vmem:[%s6062_s3 + $0x470] sm:$0xf0]  ;;  %v3915_v59 = vld [vmem:[%s6062_s3 + $0x1f4] sm:$0xf0] }
  0xb6   :  { %1989 = vmatpush.bf16.msra.mxu3 %v3107_v15  ;;  %v4024_v12 = vld [vmem:[%s6062_s3 + $0x564] sm:$0xf]  ;;  %v3376_v13 = vld [vmem:[%s6062_s3 + $0x570] sm:$0xf0]  ;;  %v3667_v15 = vor.u32 %v4096_v7, %v3664_v8  ;;  %v2790_v7 = vld [vmem:[%s6062_s3 + $0xc8] sm:$0xf] }
  0xb7   :  { %1949 = vmatpush.bf16.msra.mxu0 %v2691_v18  ;;  %1963 = vmatpush.bf16.msra.mxu1 %v2819_v19  ;;  %v4060_v17 = vld [vmem:[%s6062_s3 + $0x684] sm:$0xf]  ;;  %v3520_v51 = vld [vmem:[%s6062_s3 + $0x690] sm:$0xf0]  ;;  %v3251_v18 = vor.u32 %v3992_v9, %v3248_v10  ;;  %v3379_v19 = vor.u32 %v4024_v12, %v3376_v13  ;;  %v3879_v9 = vld [vmem:[%s6062_s3 + $0xd4] sm:$0xf0] }
  0xb8   :  { %v4092_v20 = vld [vmem:[%s6062_s3 + $0x784] sm:$0xf]  ;;  %v3648_v21 = vld [vmem:[%s6062_s3 + $0x790] sm:$0xf0]  ;;  %v3523_v28 = vor.u32 %v4060_v17, %v3520_v51  ;;  %v2918_v10 = vld [vmem:[%s6062_s3 + $0x1c8] sm:$0xf] }
  0xb9   :  { %1976 = vmatpush.bf16.msra.mxu2 %v2963_v25  ;;  %v4020_v24 = vld [vmem:[%s6062_s3 + $0x544] sm:$0xf]  ;;  %v3360_v25 = vld [vmem:[%s6062_s3 + $0x550] sm:$0xf0]  ;;  %v3651_v29 = vor.u32 %v4092_v20, %v3648_v21  ;;  %v3911_v12 = vld [vmem:[%s6062_s3 + $0x1d4] sm:$0xf0]  ;;  %v2791_v20 = vor.u32 %v3879_v9, %v2790_v7 }
  0xba   :  { %1990 = vmatpush.bf16.msra.mxu3 %v3091_v31  ;;  %1950 = vmatmul.bf16.vlgmr.msra.gmra.mxu0 %v4706_v11  ;;  %v4056_v30 = vld [vmem:[%s6062_s3 + $0x664] sm:$0xf]  ;;  %v3504_v31 = vld [vmem:[%s6062_s3 + $0x670] sm:$0xf0]  ;;  %v3363_v34 = vor.u32 %v4020_v24, %v3360_v25  ;;  %v2919_v21 = vor.u32 %v3911_v12, %v2918_v10  ;;  %v2774_v25 = vld [vmem:[%s6062_s3 + $0xa8] sm:$0xf] }
  0xbb   :  { %1998 = vmatpush.bf16.msrb.mxu0 %v3315_v22  ;;  %2012 = vmatpush.bf16.msrb.mxu1 %v3443_v23  ;;  %v3988_v22 = vld [vmem:[%s6062_s3 + $0x444] sm:$0xf]  ;;  %v3232_v23 = vld [vmem:[%s6062_s3 + $0x450] sm:$0xf0]  ;;  %v3507_v41 = vor.u32 %v4056_v30, %v3504_v31  ;;  %v2902_v31 = vld [vmem:[%s6062_s3 + $0x1a8] sm:$0xf] }
  0xbc   :  { %1964 = vmatmul.bf16.vlgmr.msra.gmra.mxu1 %v4714_v16  ;;  %v3235_v32 = vor.u32 %v3988_v22, %v3232_v23  ;;  %v4088_v35 = vld [vmem:[%s6062_s3 + $0x764] sm:$0xf]  ;;  %v3632_v36 = vld [vmem:[%s6062_s3 + $0x770] sm:$0xf0]  ;;  %v3190_v22 = vld [vmem:[%s6062_s3 + $0x3e8] sm:$0xf] }
  0xbd   :  { %1977 = vmatpush.bf16.msra.mxu2 %v2947_v45  ;;  %v3984_v37 = vld [vmem:[%s6062_s3 + $0x424] sm:$0xf]  ;;  %v3216_v38 = vld [vmem:[%s6062_s3 + $0x430] sm:$0xf0]  ;;  %v3635_v42 = vor.u32 %v4088_v35, %v3632_v36  ;;  %v3979_v23 = vld [vmem:[%s6062_s3 + $0x3f4] sm:$0xf0] }
  0xbe   :  { %1991 = vmatpush.bf16.msra.mxu3 %v3075_v49  ;;  %v4052_v43 = vld [vmem:[%s6062_s3 + $0x644] sm:$0xf]  ;;  %v3488_v45 = vld [vmem:[%s6062_s3 + $0x650] sm:$0xf0]  ;;  %v3219_v47 = vor.u32 %v3984_v37, %v3216_v38  ;;  %v3046_v35 = vld [vmem:[%s6062_s3 + $0x2c8] sm:$0xf] }
  0xbf   :  { %1999 = vmatpush.bf16.msrb.mxu0 %v3299_v39  ;;  %2013 = vmatpush.bf16.msrb.mxu1 %v3427_v40  ;;  %v4016_v39 = vld [vmem:[%s6062_s3 + $0x524] sm:$0xf]  ;;  %v3344_v40 = vld [vmem:[%s6062_s3 + $0x530] sm:$0xf0]  ;;  %v3943_v36 = vld [vmem:[%s6062_s3 + $0x2d4] sm:$0xf0] }
  0xc0   :  { %1978 = vmatmul.bf16.vlgmr.msra.gmra.mxu2 %v4750_v44  ;;  %v4084_v46 = vld [vmem:[%s6062_s3 + $0x744] sm:$0xf]  ;;  %v3347_v48 = vor.u32 %v4016_v39, %v3344_v40  ;;  %v3616_v49 = vld [vmem:[%s6062_s3 + $0x750] sm:$0xf0]  ;;  %v3174_v38 = vld [vmem:[%s6062_s3 + $0x3c8] sm:$0xf] }
  0xc1   :  { %2026 = vmatpush.bf16.msrb.mxu2 %v3571_v50  ;;  %1992 = vmatmul.bf16.vlgmr.msra.gmra.mxu3 %v4761_v26  ;;  %v3980_v50 = vld [vmem:[%s6062_s3 + $0x404] sm:$0xf]  ;;  %v3328_v54 = vld [vmem:[%s6062_s3 + $0x510] sm:$0xf0]  ;;  %v3619_v61 = vor.u32 %v4084_v46, %v3616_v49  ;;  %v3975_v39 = vld [vmem:[%s6062_s3 + $0x3d4] sm:$0xf0] }
  0xc2   :  { %2040 = vmatpush.bf16.msrb.mxu3 %v3699_v52  ;;  %v3200_v52 = vld [vmem:[%s6062_s3 + $0x410] sm:$0xf0]  ;;  %v4012_v53 = vld [vmem:[%s6062_s3 + $0x504] sm:$0xf]  ;;  %v3903_v46 = vld [vmem:[%s6062_s3 + $0x194] sm:$0xf0] }
  0xc3   :  { %2000 = vmatpush.bf16.msrb.mxu0 %v3283_v55  ;;  %2014 = vmatpush.bf16.msrb.mxu1 %v3411_v56  ;;  %v2806_v55 = vld [vmem:[%s6062_s3 + $0xe8] sm:$0xf]  ;;  %v3491_v56 = vor.u32 %v4052_v43, %v3488_v45  ;;  %v4048_v62 = vld [vmem:[%s6062_s3 + $0x624] sm:$0xf]  ;;  %v3472_v63 = vld [vmem:[%s6062_s3 + $0x630] sm:$0xf0]  ;;  %v3047_v43 = vor.u32 %v3943_v36, %v3046_v35 }
  0xc4   :  { %v4080_v3 = vld [vmem:[%s6062_s3 + $0x724] sm:$0xf]  ;;  %v3600_v4 = vld [vmem:[%s6062_s3 + $0x730] sm:$0xf0]  ;;  %v3475_v8 = vor.u32 %v4048_v62, %v3472_v63  ;;  %v2886_v45 = vld [vmem:[%s6062_s3 + $0x188] sm:$0xf] }
  0xc5   :  { %2027 = vmatpush.bf16.msrb.mxu2 %v3555_v0  ;;  %v3203_v0 = vor.u32 %v3980_v50, %v3200_v52  ;;  %v3603_v13 = vor.u32 %v4080_v3, %v3600_v4  ;;  %v4076_v17 = vld [vmem:[%s6062_s3 + $0x704] sm:$0xf]  ;;  %v3584_v51 = vld [vmem:[%s6062_s3 + $0x710] sm:$0xf0]  ;;  %v3939_v49 = vld [vmem:[%s6062_s3 + $0x2b4] sm:$0xf0] }
  0xc6   :  { %2041 = vmatpush.bf16.msrb.mxu3 %v3683_v2  ;;  %v3331_v2 = vor.u32 %v4012_v53, %v3328_v54  ;;  %v3158_v52 = vld [vmem:[%s6062_s3 + $0x3a8] sm:$0xf]  ;;  %v3971_v53 = vld [vmem:[%s6062_s3 + $0x3b4] sm:$0xf0]  ;;  %v2887_v54 = vor.u32 %v3903_v46, %v2886_v45 }
  0xc7   :  { %2001 = vmatpush.bf16.msrb.mxu0 %v3267_v5  ;;  %2015 = vmatpush.bf16.msrb.mxu1 %v3395_v6  ;;  %v2807_v5 = vor.u32 %v3883_v57, %v2806_v55  ;;  %v2935_v6 = vor.u32 %v3915_v59, %v2934_v58  ;;  %v2742_v55 = vld [vmem:[%s6062_s3 + $0x68] sm:$0xf]  ;;  %v3899_v59 = vld [vmem:[%s6062_s3 + $0x174] sm:$0xf0] }
  0xc8   :  { %v2870_v58 = vld [vmem:[%s6062_s3 + $0x168] sm:$0xf]  ;;  %v3935_v63 = vld [vmem:[%s6062_s3 + $0x294] sm:$0xf0] }
  0xc9   :  { %2028 = vmatpush.bf16.msrb.mxu2 %v3539_v14  ;;  %v4044_v14 = vld [vmem:[%s6062_s3 + $0x604] sm:$0xf]  ;;  %v3014_v62 = vld [vmem:[%s6062_s3 + $0x288] sm:$0xf]  ;;  %v3967_v3 = vld [vmem:[%s6062_s3 + $0x394] sm:$0xf0]  ;;  %v2871_v4 = vor.u32 %v3899_v59, %v2870_v58 }
  0xca   :  { %2042 = vmatpush.bf16.msrb.mxu3 %v3667_v15  ;;  %v3456_v15 = vld [vmem:[%s6062_s3 + $0x610] sm:$0xf0]  ;;  %v3015_v7 = vor.u32 %v3935_v63, %v3014_v62  ;;  %v3895_v9 = vld [vmem:[%s6062_s3 + $0x154] sm:$0xf0]  ;;  %v2998_v12 = vld [vmem:[%s6062_s3 + $0x268] sm:$0xf] }
  0xcb   :  { %2002 = vmatpush.bf16.msrb.mxu0 %v3251_v18  ;;  %2016 = vmatpush.bf16.msrb.mxu1 %v3379_v19  ;;  %v3062_v18 = vld [vmem:[%s6062_s3 + $0x2e8] sm:$0xf]  ;;  %v3947_v19 = vld [vmem:[%s6062_s3 + $0x2f4] sm:$0xf0]  ;;  %v3459_v24 = vor.u32 %v4044_v14, %v3456_v15 }
  0xcc   :  { %v3063_v30 = vor.u32 %v3947_v19, %v3062_v18  ;;  %v3126_v15 = vld [vmem:[%s6062_s3 + $0x368] sm:$0xf]  ;;  %v3859_v19 = vld [vmem:[%s6062_s3 + $0x34] sm:$0xf0] }
  0xcd   :  { %2029 = vmatpush.bf16.msrb.mxu2 %v3523_v28  ;;  %v3875_v28 = vld [vmem:[%s6062_s3 + $0xb4] sm:$0xf0]  ;;  %v2710_v18 = vld [vmem:[%s6062_s3 + $0x28] sm:$0xf] }
  0xce   :  { %2043 = vmatpush.bf16.msrb.mxu3 %v3651_v29  ;;  %v3587_v29 = vor.u32 %v4076_v17, %v3584_v51  ;;  %v2775_v37 = vor.u32 %v3875_v28, %v2774_v25  ;;  %v3963_v17 = vld [vmem:[%s6062_s3 + $0x374] sm:$0xf0]  ;;  %v2711_v28 = vor.u32 %v3859_v19, %v2710_v18  ;;  %v2822_v35 = vld [vmem:[%s6062_s3 + $0x108] sm:$0xf] }
  0xcf   :  { %2003 = vmatpush.bf16.msrb.mxu0 %v3235_v32  ;;  %2017 = vmatpush.bf16.msrb.mxu1 %v3363_v34  ;;  %v3907_v32 = vld [vmem:[%s6062_s3 + $0x1b4] sm:$0xf0]  ;;  %v3191_v34 = vor.u32 %v3979_v23, %v3190_v22  ;;  %v3127_v23 = vor.u32 %v3963_v17, %v3126_v15  ;;  %v2950_v59 = vld [vmem:[%s6062_s3 + $0x208] sm:$0xf] }
  0xd0   :  { %v2903_v40 = vor.u32 %v3907_v32, %v2902_v31  ;;  %v3891_v22 = vld [vmem:[%s6062_s3 + $0x134] sm:$0xf0]  ;;  %v2694_v31 = vld [vmem:[%s6062_s3 + $0x8] sm:$0xf] }
  0xd1   :  { %2030 = vmatpush.bf16.msrb.mxu2 %v3507_v41  ;;  %v2758_v41 = vld [vmem:[%s6062_s3 + $0x88] sm:$0xf]  ;;  %v3927_v25 = vld [vmem:[%s6062_s3 + $0x254] sm:$0xf0] }
  0xd2   :  { %2044 = vmatpush.bf16.msrb.mxu3 %v3635_v42  ;;  %v3871_v42 = vld [vmem:[%s6062_s3 + $0x94] sm:$0xf0]  ;;  %v3078_v62 = vld [vmem:[%s6062_s3 + $0x308] sm:$0xf] }
  0xd3   :  { %2004 = vmatpush.bf16.msrb.mxu0 %v3219_v47  ;;  %2018 = vmatpush.bf16.msrb.mxu1 %v3347_v48  ;;  %v3175_v47 = vor.u32 %v3975_v39, %v3174_v38  ;;  %v3030_v48 = vld [vmem:[%s6062_s3 + $0x2a8] sm:$0xf]  ;;  %v2759_v50 = vor.u32 %v3871_v42, %v2758_v41  ;;  %v3887_v36 = vld [vmem:[%s6062_s3 + $0x114] sm:$0xf0] }
  0xd4   :  { %v3031_v57 = vor.u32 %v3939_v49, %v3030_v48  ;;  %v3318_v38 = vld [vmem:[%s6062_s3 + $0x4e8] sm:$0xf]  ;;  %v4011_v39 = vld [vmem:[%s6062_s3 + $0x4f4] sm:$0xf0]  ;;  %v2823_v49 = vor.u32 %v3887_v36, %v2822_v35 }
  0xd5   :  { %2031 = vmatpush.bf16.msrb.mxu2 %v3491_v56  ;;  %v3867_v56 = vld [vmem:[%s6062_s3 + $0x74] sm:$0xf0]  ;;  %v3558_v17 = vld [vmem:[%s6062_s3 + $0x6c8] sm:$0xf] }
  0xd6   :  { %2045 = vmatpush.bf16.msrb.mxu3 %v3619_v61  ;;  %v3159_v61 = vor.u32 %v3971_v53, %v3158_v52  ;;  %v4043_v42 = vld [vmem:[%s6062_s3 + $0x5f4] sm:$0xf0]  ;;  %v3302_v52 = vld [vmem:[%s6062_s3 + $0x4c8] sm:$0xf] }
  0xd7   :  { %2005 = vmatpush.bf16.msrb.mxu0 %v3203_v0  ;;  %2019 = vmatpush.bf16.msrb.mxu1 %v3331_v2  ;;  %v2743_v0 = vor.u32 %v3867_v56, %v2742_v55  ;;  %v3142_v2 = vld [vmem:[%s6062_s3 + $0x388] sm:$0xf]  ;;  %v3923_v45 = vld [vmem:[%s6062_s3 + $0x234] sm:$0xf0] }
  0xd8   :  { %v3143_v10 = vor.u32 %v3967_v3, %v3142_v2  ;;  %v3955_v48 = vld [vmem:[%s6062_s3 + $0x334] sm:$0xf0]  ;;  %v3430_v56 = vld [vmem:[%s6062_s3 + $0x5c8] sm:$0xf] }
  0xd9   :  { %2032 = vmatpush.bf16.msrb.mxu2 %v3475_v8  ;;  %v2854_v8 = vld [vmem:[%s6062_s3 + $0x148] sm:$0xf]  ;;  %v4007_v55 = vld [vmem:[%s6062_s3 + $0x4d4] sm:$0xf0] }
  0xda   :  { %2046 = vmatpush.bf16.msrb.mxu3 %v3603_v13  ;;  %2006 = vmatmul.bf16.vlgmr.msrb.gmra.mxu0 %v4812_v27  ;;  %v3931_v13 = vld [vmem:[%s6062_s3 + $0x274] sm:$0xf0]  ;;  %v2855_v51 = vor.u32 %v3895_v9, %v2854_v8  ;;  %v3303_v3 = vor.u32 %v4007_v55, %v3302_v52  ;;  %v3286_v8 = vld [vmem:[%s6062_s3 + $0x4a8] sm:$0xf] }
  0xdb   :  { %2054 = vmatpush.bf16.msra.mxu0 %v2807_v5  ;;  %2068 = vmatpush.bf16.msra.mxu1 %v2935_v6  ;;  %v2726_v5 = vld [vmem:[%s6062_s3 + $0x48] sm:$0xf]  ;;  %v3863_v6 = vld [vmem:[%s6062_s3 + $0x54] sm:$0xf0] }
  0xdc   :  { %2020 = vmatmul.bf16.vlgmr.msrb.gmra.mxu1 %v4823_v33  ;;  %v2727_v14 = vor.u32 %v3863_v6, %v2726_v5  ;;  %v3951_v63 = vld [vmem:[%s6062_s3 + $0x314] sm:$0xf0]  ;;  %v3686_v19 = vld [vmem:[%s6062_s3 + $0x7c8] sm:$0xf] }
  0xdd   :  { %2033 = vmatpush.bf16.msrb.mxu2 %v3459_v24  ;;  %v2982_v24 = vld [vmem:[%s6062_s3 + $0x248] sm:$0xf]  ;;  %v4075_v2 = vld [vmem:[%s6062_s3 + $0x6f4] sm:$0xf0] }
  0xde   :  { %2047 = vmatpush.bf16.msrb.mxu3 %v3587_v29  ;;  %v3110_v29 = vld [vmem:[%s6062_s3 + $0x348] sm:$0xf]  ;;  %v4107_v5 = vld [vmem:[%s6062_s3 + $0x7f4] sm:$0xf0] }
  0xdf   :  { %2055 = vmatpush.bf16.msra.mxu0 %v2791_v20  ;;  %2069 = vmatpush.bf16.msra.mxu1 %v2919_v21  ;;  %v2999_v20 = vor.u32 %v3931_v13, %v2998_v12  ;;  %v2838_v21 = vld [vmem:[%s6062_s3 + $0x128] sm:$0xf]  ;;  %v4003_v9 = vld [vmem:[%s6062_s3 + $0x4b4] sm:$0xf0] }
  0xe0   :  { %2034 = vmatmul.bf16.vlgmr.msrb.gmra.mxu2 %v4860_v60  ;;  %v2839_v32 = vor.u32 %v3891_v22, %v2838_v21  ;;  %v3414_v13 = vld [vmem:[%s6062_s3 + $0x5a8] sm:$0xf]  ;;  %v3287_v18 = vor.u32 %v4003_v9, %v3286_v8  ;;  %v4099_v35 = vld [vmem:[%s6062_s3 + $0x7b4] sm:$0xf0] }
  0xe1   :  { %2082 = vmatpush.bf16.msra.mxu2 %v3063_v30  ;;  %2048 = vmatmul.bf16.vlgmr.msrb.gmra.mxu3 %v4871_v1  ;;  %v3959_v30 = vld [vmem:[%s6062_s3 + $0x354] sm:$0xf0]  ;;  %v3270_v22 = vld [vmem:[%s6062_s3 + $0x488] sm:$0xf] }
  0xe2   :  { %2096 = vmatpush.bf16.msra.mxu3 %v3191_v34  ;;  %v3855_v34 = vld [vmem:[%s6062_s3 + $0x14] sm:$0xf0]  ;;  %v3111_v41 = vor.u32 %v3959_v30, %v3110_v29  ;;  %v3542_v30 = vld [vmem:[%s6062_s3 + $0x6a8] sm:$0xf] }
  0xe3   :  { %2056 = vmatpush.bf16.msra.mxu0 %v2775_v37  ;;  %2070 = vmatpush.bf16.msra.mxu1 %v2903_v40  ;;  %v2983_v37 = vor.u32 %v3927_v25, %v2982_v24  ;;  %v3446_v40 = vld [vmem:[%s6062_s3 + $0x5e8] sm:$0xf]  ;;  %v2695_v46 = vor.u32 %v3855_v34, %v2694_v31  ;;  %v4067_v31 = vld [vmem:[%s6062_s3 + $0x6b4] sm:$0xf0] }
  0xe4   :  { %v3447_v53 = vor.u32 %v4043_v42, %v3446_v40  ;;  %v3398_v25 = vld [vmem:[%s6062_s3 + $0x588] sm:$0xf]  ;;  %v3991_v52 = vld [vmem:[%s6062_s3 + $0x454] sm:$0xf0] }
  0xe5   :  { %2083 = vmatpush.bf16.msra.mxu2 %v3047_v43  ;;  %v2966_v43 = vld [vmem:[%s6062_s3 + $0x228] sm:$0xf]  ;;  %v4023_v55 = vld [vmem:[%s6062_s3 + $0x554] sm:$0xf0] }
  0xe6   :  { %2097 = vmatpush.bf16.msra.mxu3 %v3175_v47  ;;  %v3094_v47 = vld [vmem:[%s6062_s3 + $0x328] sm:$0xf]  ;;  %v4055_v8 = vld [vmem:[%s6062_s3 + $0x654] sm:$0xf0] }
  0xe7   :  { %2057 = vmatpush.bf16.msra.mxu0 %v2759_v50  ;;  %2071 = vmatpush.bf16.msra.mxu1 %v2887_v54  ;;  %v3319_v50 = vor.u32 %v4011_v39, %v3318_v38  ;;  %v2967_v54 = vor.u32 %v3923_v45, %v2966_v43  ;;  %v3095_v58 = vor.u32 %v3955_v48, %v3094_v47  ;;  %v3670_v34 = vld [vmem:[%s6062_s3 + $0x7a8] sm:$0xf]  ;;  %v3995_v38 = vld [vmem:[%s6062_s3 + $0x474] sm:$0xf0] }
  0xe8   :  { %v3543_v39 = vor.u32 %v4067_v31, %v3542_v30  ;;  %v3382_v40 = vld [vmem:[%s6062_s3 + $0x568] sm:$0xf]  ;;  %v3671_v42 = vor.u32 %v4099_v35, %v3670_v34  ;;  %v4063_v45 = vld [vmem:[%s6062_s3 + $0x694] sm:$0xf0]  ;;  %v3877_v34 = vld [vmem:[%s6062_s3 + $0xcc] sm:$0xf] }
  0xe9   :  { %2084 = vmatpush.bf16.msra.mxu2 %v3031_v57  ;;  %v4039_v57 = vld [vmem:[%s6062_s3 + $0x5d4] sm:$0xf0]  ;;  %v3526_v43 = vld [vmem:[%s6062_s3 + $0x688] sm:$0xf] }
  0xea   :  { %2098 = vmatpush.bf16.msra.mxu3 %v3159_v61  ;;  %v3919_v61 = vld [vmem:[%s6062_s3 + $0x214] sm:$0xf0]  ;;  %v3431_v6 = vor.u32 %v4039_v57, %v3430_v56  ;;  %v3654_v47 = vld [vmem:[%s6062_s3 + $0x788] sm:$0xf] }
  0xeb   :  { %2058 = vmatpush.bf16.msra.mxu0 %v2743_v0  ;;  %2072 = vmatpush.bf16.msra.mxu1 %v2871_v4  ;;  %v3574_v0 = vld [vmem:[%s6062_s3 + $0x6e8] sm:$0xf]  ;;  %v4095_v48 = vld [vmem:[%s6062_s3 + $0x794] sm:$0xf0] }
  0xec   :  { %v3702_v4 = vld [vmem:[%s6062_s3 + $0x7e8] sm:$0xf]  ;;  %v3575_v12 = vor.u32 %v4075_v2, %v3574_v0  ;;  %v3655_v56 = vor.u32 %v4095_v48, %v3654_v47  ;;  %v3987_v2 = vld [vmem:[%s6062_s3 + $0x434] sm:$0xf0]  ;;  %v3064_v47 = vld [vmem:[%s6062_s3 + $0x2f8] sm:$0xf0] }
  0xed   :  { %2085 = vmatpush.bf16.msra.mxu2 %v3015_v7  ;;  %v2951_v7 = vor.u32 %v3919_v61, %v2950_v59  ;;  %v3703_v15 = vor.u32 %v4107_v5, %v3702_v4  ;;  %v3510_v57 = vld [vmem:[%s6062_s3 + $0x668] sm:$0xf]  ;;  %v4019_v5 = vld [vmem:[%s6062_s3 + $0x534] sm:$0xf0] }
  0xee   :  { %2099 = vmatpush.bf16.msra.mxu3 %v3143_v10  ;;  %v3079_v10 = vor.u32 %v3951_v63, %v3078_v62  ;;  %v3638_v61 = vld [vmem:[%s6062_s3 + $0x768] sm:$0xf]  ;;  %v4091_v62 = vld [vmem:[%s6062_s3 + $0x774] sm:$0xf0] }
  0xef   :  { %2059 = vmatpush.bf16.msra.mxu0 %v2727_v14  ;;  %2073 = vmatpush.bf16.msra.mxu1 %v2855_v51  ;;  %v4035_v14 = vld [vmem:[%s6062_s3 + $0x5b4] sm:$0xf0]  ;;  %v3222_v0 = vld [vmem:[%s6062_s3 + $0x428] sm:$0xf] }
  0xf0   :  { %v4071_v51 = vld [vmem:[%s6062_s3 + $0x6d4] sm:$0xf0]  ;;  %v3415_v21 = vor.u32 %v4035_v14, %v3414_v13  ;;  %v3350_v4 = vld [vmem:[%s6062_s3 + $0x528] sm:$0xf]  ;;  %v3223_v9 = vor.u32 %v3987_v2, %v3222_v0  ;;  %v3973_v2 = vld [vmem:[%s6062_s3 + $0x3cc] sm:$0xf] }
  0xf1   :  { %2086 = vmatpush.bf16.msra.mxu2 %v2999_v20  ;;  %v4103_v20 = vld [vmem:[%s6062_s3 + $0x7d4] sm:$0xf0]  ;;  %v3559_v24 = vor.u32 %v4071_v51, %v3558_v17  ;;  %v3206_v13 = vld [vmem:[%s6062_s3 + $0x408] sm:$0xf]  ;;  %v3351_v14 = vor.u32 %v4019_v5, %v3350_v4  ;;  %v3869_v5 = vld [vmem:[%s6062_s3 + $0x8c] sm:$0xf] }
  0xf2   :  { %2100 = vmatpush.bf16.msra.mxu3 %v3127_v23  ;;  %v3999_v23 = vld [vmem:[%s6062_s3 + $0x494] sm:$0xf0]  ;;  %v3687_v29 = vor.u32 %v4103_v20, %v3686_v19  ;;  %v3334_v17 = vld [vmem:[%s6062_s3 + $0x508] sm:$0xf]  ;;  %v3881_v19 = vld [vmem:[%s6062_s3 + $0xec] sm:$0xf] }
  0xf3   :  { %2060 = vmatpush.bf16.msra.mxu0 %v2711_v28  ;;  %2074 = vmatpush.bf16.msra.mxu1 %v2839_v32  ;;  %v4031_v28 = vld [vmem:[%s6062_s3 + $0x594] sm:$0xf0]  ;;  %v3271_v32 = vor.u32 %v3999_v23, %v3270_v22  ;;  %v2808_v20 = vld [vmem:[%s6062_s3 + $0xf8] sm:$0xf0] }
  0xf4   :  { %v3399_v36 = vor.u32 %v4031_v28, %v3398_v25  ;;  %v4015_v51 = vld [vmem:[%s6062_s3 + $0x514] sm:$0xf0]  ;;  %v2936_v23 = vld [vmem:[%s6062_s3 + $0x1f8] sm:$0xf0] }
  0xf5   :  { %2087 = vmatpush.bf16.msra.mxu2 %v2983_v37  ;;  %v3254_v37 = vld [vmem:[%s6062_s3 + $0x468] sm:$0xf]  ;;  %v4051_v25 = vld [vmem:[%s6062_s3 + $0x634] sm:$0xf0]  ;;  %v3335_v31 = vor.u32 %v4015_v51, %v3334_v17  ;;  %v3160_v17 = vld [vmem:[%s6062_s3 + $0x3b8] sm:$0xf0] }
  0xf6   :  { %2101 = vmatpush.bf16.msra.mxu3 %v3111_v41  ;;  %v4027_v41 = vld [vmem:[%s6062_s3 + $0x574] sm:$0xf0] }
  0xf7   :  { %2061 = vmatpush.bf16.msra.mxu0 %v2695_v46  ;;  %2075 = vmatpush.bf16.msra.mxu1 %v2823_v49  ;;  %v3255_v46 = vor.u32 %v3995_v38, %v3254_v37  ;;  %v3383_v49 = vor.u32 %v4027_v41, %v3382_v40  ;;  %v4083_v30 = vld [vmem:[%s6062_s3 + $0x734] sm:$0xf0]  ;;  %v2792_v37 = vld [vmem:[%s6062_s3 + $0xd8] sm:$0xf0]  ;;  %v3909_v38 = vld [vmem:[%s6062_s3 + $0x1cc] sm:$0xf] }
  0xf8   :  { %v3462_v41 = vld [vmem:[%s6062_s3 + $0x608] sm:$0xf]  ;;  %v2795_v48 = vor.u32 %v3877_v34, %v2792_v37  ;;  %v3861_v34 = vld [vmem:[%s6062_s3 + $0x4c] sm:$0xf] }
  0xf9   :  { %2088 = vmatpush.bf16.msra.mxu2 %v2967_v54  ;;  %v3366_v54 = vld [vmem:[%s6062_s3 + $0x548] sm:$0xf]  ;;  %v3893_v37 = vld [vmem:[%s6062_s3 + $0x14c] sm:$0xf] }
  0xfa   :  { %2102 = vmatpush.bf16.msra.mxu3 %v3095_v58  ;;  %2062 = vmatmul.bf16.vlgmr.msra.gmra.mxu0 %v4706_v11  ;;  %v4059_v58 = vld [vmem:[%s6062_s3 + $0x674] sm:$0xf0]  ;;  %v3367_v63 = vor.u32 %v4023_v55, %v3366_v54  ;;  %v3873_v54 = vld [vmem:[%s6062_s3 + $0xac] sm:$0xf]  ;;  %v2776_v55 = vld [vmem:[%s6062_s3 + $0xb8] sm:$0xf0] }
  0xfb   :  { %2110 = vmatpush.bf16.msrb.mxu0 %v3319_v50  ;;  %2124 = vmatpush.bf16.msrb.mxu1 %v3447_v53  ;;  %v3238_v50 = vld [vmem:[%s6062_s3 + $0x448] sm:$0xf]  ;;  %v3527_v53 = vor.u32 %v4063_v45, %v3526_v43  ;;  %v4079_v45 = vld [vmem:[%s6062_s3 + $0x714] sm:$0xf0]  ;;  %v2779_v0 = vor.u32 %v3873_v54, %v2776_v55  ;;  %v3925_v55 = vld [vmem:[%s6062_s3 + $0x24c] sm:$0xf] }
  0xfc   :  { %2076 = vmatmul.bf16.vlgmr.msra.gmra.mxu1 %v4714_v16  ;;  %v3239_v59 = vor.u32 %v3991_v52, %v3238_v50  ;;  %v3590_v43 = vld [vmem:[%s6062_s3 + $0x708] sm:$0xf]  ;;  %v3192_v50 = vld [vmem:[%s6062_s3 + $0x3f8] sm:$0xf0] }
  0xfd   :  { %2089 = vmatpush.bf16.msra.mxu2 %v2951_v7  ;;  %v3494_v7 = vld [vmem:[%s6062_s3 + $0x648] sm:$0xf] }
  0xfe   :  { %2103 = vmatpush.bf16.msra.mxu3 %v3079_v10  ;;  %v3622_v10 = vld [vmem:[%s6062_s3 + $0x748] sm:$0xf] }
  0xff   :  { %2111 = vmatpush.bf16.msrb.mxu0 %v3303_v3  ;;  %2125 = vmatpush.bf16.msrb.mxu1 %v3431_v6  ;;  %v3511_v3 = vor.u32 %v4059_v58, %v3510_v57  ;;  %v3639_v6 = vor.u32 %v4091_v62, %v3638_v61  ;;  %v3905_v58 = vld [vmem:[%s6062_s3 + $0x1ac] sm:$0xf] }
 0x100   :  { %2090 = vmatmul.bf16.vlgmr.msra.gmra.mxu2 %v4750_v44  ;;  %v3941_v62 = vld [vmem:[%s6062_s3 + $0x2cc] sm:$0xf] }
 0x101   :  { %2138 = vmatpush.bf16.msrb.mxu2 %v3575_v12  ;;  %2104 = vmatmul.bf16.vlgmr.msra.gmra.mxu3 %v4761_v26  ;;  %v4087_v12 = vld [vmem:[%s6062_s3 + $0x754] sm:$0xf0] }
 0x102   :  { %2152 = vmatpush.bf16.msrb.mxu3 %v3703_v15  ;;  %v3983_v15 = vld [vmem:[%s6062_s3 + $0x414] sm:$0xf0]  ;;  %v3623_v22 = vor.u32 %v4087_v12, %v3622_v10  ;;  %v3937_v12 = vld [vmem:[%s6062_s3 + $0x2ac] sm:$0xf] }
 0x103   :  { %2112 = vmatpush.bf16.msrb.mxu0 %v3287_v18  ;;  %2126 = vmatpush.bf16.msrb.mxu1 %v3415_v21  ;;  %v3495_v18 = vor.u32 %v4055_v8, %v3494_v7  ;;  %v3913_v21 = vld [vmem:[%s6062_s3 + $0x1ec] sm:$0xf]  ;;  %v3207_v28 = vor.u32 %v3983_v15, %v3206_v13  ;;  %v3032_v13 = vld [vmem:[%s6062_s3 + $0x2b8] sm:$0xf0] }
 0x104   :  { %v2939_v35 = vor.u32 %v3913_v21, %v2936_v23  ;;  %v3901_v8 = vld [vmem:[%s6062_s3 + $0x18c] sm:$0xf] }
 0x105   :  { %2139 = vmatpush.bf16.msrb.mxu2 %v3559_v24  ;;  %v3478_v24 = vld [vmem:[%s6062_s3 + $0x628] sm:$0xf]  ;;  %v3969_v15 = vld [vmem:[%s6062_s3 + $0x3ac] sm:$0xf] }
 0x106   :  { %2153 = vmatpush.bf16.msrb.mxu3 %v3687_v29  ;;  %v3606_v29 = vld [vmem:[%s6062_s3 + $0x728] sm:$0xf]  ;;  %v3897_v21 = vld [vmem:[%s6062_s3 + $0x16c] sm:$0xf]  ;;  %v3163_v23 = vor.u32 %v3969_v15, %v3160_v17 }
 0x107   :  { %2113 = vmatpush.bf16.msrb.mxu0 %v3271_v32  ;;  %2127 = vmatpush.bf16.msrb.mxu1 %v3399_v36  ;;  %v2811_v32 = vor.u32 %v3881_v19, %v2808_v20  ;;  %v3479_v36 = vor.u32 %v4051_v25, %v3478_v24  ;;  %v3607_v40 = vor.u32 %v4083_v30, %v3606_v29  ;;  %v2744_v19 = vld [vmem:[%s6062_s3 + $0x78] sm:$0xf0]  ;;  %v3933_v24 = vld [vmem:[%s6062_s3 + $0x28c] sm:$0xf] }
 0x108   :  { %v3035_v20 = vor.u32 %v3937_v12, %v3032_v13  ;;  %v3016_v25 = vld [vmem:[%s6062_s3 + $0x298] sm:$0xf0]  ;;  %v3965_v29 = vld [vmem:[%s6062_s3 + $0x38c] sm:$0xf] }
 0x109   :  { %2140 = vmatpush.bf16.msrb.mxu2 %v3543_v39  ;;  %v2920_v39 = vld [vmem:[%s6062_s3 + $0x1d8] sm:$0xf0]  ;;  %v3921_v12 = vld [vmem:[%s6062_s3 + $0x22c] sm:$0xf] }
 0x10a   :  { %2154 = vmatpush.bf16.msrb.mxu3 %v3671_v42  ;;  %v4047_v42 = vld [vmem:[%s6062_s3 + $0x614] sm:$0xf0]  ;;  %v2923_v52 = vor.u32 %v3909_v38, %v2920_v39  ;;  %v3144_v30 = vld [vmem:[%s6062_s3 + $0x398] sm:$0xf0]  ;;  %v3953_v17 = vld [vmem:[%s6062_s3 + $0x32c] sm:$0xf] }
 0x10b   :  { %2114 = vmatpush.bf16.msrb.mxu0 %v3255_v46  ;;  %2128 = vmatpush.bf16.msrb.mxu1 %v3383_v49  ;;  %v3945_v46 = vld [vmem:[%s6062_s3 + $0x2ec] sm:$0xf]  ;;  %v2856_v38 = vld [vmem:[%s6062_s3 + $0x158] sm:$0xf0]  ;;  %v3147_v39 = vor.u32 %v3965_v29, %v3144_v30 }
 0x10c   :  { %v3977_v49 = vld [vmem:[%s6062_s3 + $0x3ec] sm:$0xf]  ;;  %v3067_v57 = vor.u32 %v3945_v46, %v3064_v47  ;;  %v2859_v46 = vor.u32 %v3893_v37, %v2856_v38  ;;  %v2968_v13 = vld [vmem:[%s6062_s3 + $0x238] sm:$0xf0] }
 0x10d   :  { %2141 = vmatpush.bf16.msrb.mxu2 %v3527_v53  ;;  %v3463_v53 = vor.u32 %v4047_v42, %v3462_v41  ;;  %v3195_v61 = vor.u32 %v3977_v49, %v3192_v50  ;;  %v3000_v41 = vld [vmem:[%s6062_s3 + $0x278] sm:$0xf0]  ;;  %v3857_v47 = vld [vmem:[%s6062_s3 + $0x2c] sm:$0xf] }
 0x10e   :  { %2155 = vmatpush.bf16.msrb.mxu3 %v3655_v56  ;;  %v3591_v56 = vor.u32 %v4079_v45, %v3590_v43  ;;  %v3961_v43 = vld [vmem:[%s6062_s3 + $0x36c] sm:$0xf]  ;;  %v3128_v45 = vld [vmem:[%s6062_s3 + $0x378] sm:$0xf0] }
 0x10f   :  { %2115 = vmatpush.bf16.msrb.mxu0 %v3239_v59  ;;  %2129 = vmatpush.bf16.msrb.mxu1 %v3367_v63  ;;  %v2904_v59 = vld [vmem:[%s6062_s3 + $0x1b8] sm:$0xf0]  ;;  %v3889_v50 = vld [vmem:[%s6062_s3 + $0x12c] sm:$0xf]  ;;  %v3131_v54 = vor.u32 %v3961_v43, %v3128_v45 }
 0x110   :  { %v3048_v63 = vld [vmem:[%s6062_s3 + $0x2d8] sm:$0xf0]  ;;  %v2907_v4 = vor.u32 %v3905_v58, %v2904_v59  ;;  %v3957_v58 = vld [vmem:[%s6062_s3 + $0x34c] sm:$0xf] }
 0x111   :  { %2142 = vmatpush.bf16.msrb.mxu2 %v3511_v3  ;;  %v3176_v3 = vld [vmem:[%s6062_s3 + $0x3d8] sm:$0xf0]  ;;  %v3051_v7 = vor.u32 %v3941_v62, %v3048_v63  ;;  %v3917_v29 = vld [vmem:[%s6062_s3 + $0x20c] sm:$0xf] }
 0x112   :  { %2156 = vmatpush.bf16.msrb.mxu3 %v3639_v6  ;;  %v2760_v6 = vld [vmem:[%s6062_s3 + $0x98] sm:$0xf0]  ;;  %v3179_v10 = vor.u32 %v3973_v2, %v3176_v3  ;;  %v4001_v43 = vld [vmem:[%s6062_s3 + $0x4ac] sm:$0xf] }
 0x113   :  { %2116 = vmatpush.bf16.msrb.mxu0 %v3223_v9  ;;  %2130 = vmatpush.bf16.msrb.mxu1 %v3351_v14  ;;  %v2888_v9 = vld [vmem:[%s6062_s3 + $0x198] sm:$0xf0]  ;;  %v2763_v14 = vor.u32 %v3869_v5, %v2760_v6  ;;  %v4041_v6 = vld [vmem:[%s6062_s3 + $0x5ec] sm:$0xf] }
 0x114   :  { %v2891_v51 = vor.u32 %v3901_v8, %v2888_v9  ;;  %v3112_v59 = vld [vmem:[%s6062_s3 + $0x358] sm:$0xf0] }
 0x115   :  { %2143 = vmatpush.bf16.msrb.mxu2 %v3495_v18  ;;  %v3865_v18 = vld [vmem:[%s6062_s3 + $0x6c] sm:$0xf]  ;;  %v2696_v63 = vld [vmem:[%s6062_s3 + $0x18] sm:$0xf0]  ;;  %v3115_v9 = vor.u32 %v3957_v58, %v3112_v59 }
 0x116   :  { %2157 = vmatpush.bf16.msrb.mxu3 %v3623_v22  ;;  %v2872_v22 = vld [vmem:[%s6062_s3 + $0x178] sm:$0xf0] }
 0x117   :  { %2117 = vmatpush.bf16.msrb.mxu0 %v3207_v28  ;;  %2131 = vmatpush.bf16.msrb.mxu1 %v3335_v31  ;;  %v2747_v28 = vor.u32 %v3865_v18, %v2744_v19  ;;  %v5614_v31 = vpop.f32.mrf.mxu0  ;;  %v2824_v2 = vld [vmem:[%s6062_s3 + $0x118] sm:$0xf0] }
 0x118   :  { %v3320_v5 = vld [vmem:[%s6062_s3 + $0x4f8] sm:$0xf0] }
 0x119   :  { %2144 = vmatpush.bf16.msrb.mxu2 %v3479_v36  ;;  %v3019_v36 = vor.u32 %v3933_v24, %v3016_v25  ;;  %v4037_v24 = vld [vmem:[%s6062_s3 + $0x5cc] sm:$0xf]  ;;  %v3432_v25 = vld [vmem:[%s6062_s3 + $0x5d8] sm:$0xf0] }
 0x11a   :  { %2158 = vmatpush.bf16.msrb.mxu3 %v3607_v40  ;;  %2118 = vmatmul.bf16.vlgmr.msrb.gmra.mxu0 %v4812_v27  ;;  %v3929_v40 = vld [vmem:[%s6062_s3 + $0x26c] sm:$0xf]  ;;  %v2952_v30 = vld [vmem:[%s6062_s3 + $0x218] sm:$0xf0] }
 0x11b   :  { %2166 = vmatpush.bf16.msra.mxu0 %v2811_v32  ;;  %2180 = vmatpush.bf16.msra.mxu1 %v2939_v35  ;;  %v2875_v32 = vor.u32 %v3897_v21, %v2872_v22  ;;  %v2728_v35 = vld [vmem:[%s6062_s3 + $0x58] sm:$0xf0]  ;;  %v3003_v49 = vor.u32 %v3929_v40, %v3000_v41  ;;  %v2971_v22 = vor.u32 %v3921_v12, %v2968_v13  ;;  %v3993_v13 = vld [vmem:[%s6062_s3 + $0x46c] sm:$0xf] }
 0x11c   :  { %2132 = vmatmul.bf16.vlgmr.msrb.gmra.mxu1 %v4823_v33  ;;  %v2731_v42 = vor.u32 %v3861_v34, %v2728_v35  ;;  %v3080_v34 = vld [vmem:[%s6062_s3 + $0x318] sm:$0xf0]  ;;  %v4073_v35 = vld [vmem:[%s6062_s3 + $0x6ec] sm:$0xf]  ;;  %v3435_v41 = vor.u32 %v4037_v24, %v3432_v25 }
 0x11d   :  { %2145 = vmatpush.bf16.msrb.mxu2 %v3463_v53  ;;  %v5652_v53 = vpop.f32.mrf.mxu1  ;;  %v3704_v40 = vld [vmem:[%s6062_s3 + $0x7f8] sm:$0xf0]  ;;  %v3989_v25 = vld [vmem:[%s6062_s3 + $0x44c] sm:$0xf] }
 0x11e   :  { %2159 = vmatpush.bf16.msrb.mxu3 %v3591_v56  ;;  %v2984_v56 = vld [vmem:[%s6062_s3 + $0x258] sm:$0xf0] }
 0x11f   :  { %2167 = vmatpush.bf16.msra.mxu0 %v2795_v48  ;;  %2181 = vmatpush.bf16.msra.mxu1 %v2923_v52  ;;  %v2712_v48 = vld [vmem:[%s6062_s3 + $0x38] sm:$0xf0]  ;;  %v2987_v3 = vor.u32 %v3925_v55, %v2984_v56 }
 0x120   :  { %2146 = vmatmul.bf16.vlgmr.msrb.gmra.mxu2 %v4860_v60  ;;  %v2840_v52 = vld [vmem:[%s6062_s3 + $0x138] sm:$0xf0] }
 0x121   :  { %2194 = vmatpush.bf16.msra.mxu2 %v3067_v57  ;;  %2160 = vmatmul.bf16.vlgmr.msrb.gmra.mxu3 %v4871_v1  ;;  %v2715_v57 = vor.u32 %v3857_v47, %v2712_v48  ;;  %v2843_v62 = vor.u32 %v3889_v50, %v2840_v52  ;;  %v3288_v45 = vld [vmem:[%s6062_s3 + $0x4b8] sm:$0xf0]  ;;  %v4033_v48 = vld [vmem:[%s6062_s3 + $0x5ac] sm:$0xf] }
 0x122   :  { %2208 = vmatpush.bf16.msra.mxu3 %v3195_v61  ;;  %v3853_v61 = vld [vmem:[%s6062_s3 + $0xc] sm:$0xf]  ;;  %v3291_v56 = vor.u32 %v4001_v43, %v3288_v45  ;;  %v3640_v43 = vld [vmem:[%s6062_s3 + $0x778] sm:$0xf0] }
 0x123   :  { %2168 = vmatpush.bf16.msra.mxu0 %v2779_v0  ;;  %2182 = vmatpush.bf16.msra.mxu1 %v2907_v4  ;;  %v3885_v0 = vld [vmem:[%s6062_s3 + $0x10c] sm:$0xf]  ;;  %v5689_v8 = vpop.f32.mrf.mxu2  ;;  %v2699_v15 = vor.u32 %v3853_v61, %v2696_v63 }
 0x124   :  { %v4009_v4 = vld [vmem:[%s6062_s3 + $0x4ec] sm:$0xf]  ;;  %v2827_v18 = vor.u32 %v3885_v0, %v2824_v2  ;;  %v3400_v2 = vld [vmem:[%s6062_s3 + $0x598] sm:$0xf0] }
 0x125   :  { %2195 = vmatpush.bf16.msra.mxu2 %v3051_v7  ;;  %v5687_v7 = vpop.f32.mrf.mxu0  ;;  %v3323_v19 = vor.u32 %v4009_v4, %v3320_v5  ;;  %v5738_v37 = vpop.f32.mrf.mxu1  ;;  %v4069_v52 = vld [vmem:[%s6062_s3 + $0x6cc] sm:$0xf]  ;;  %v3544_v5 = vld [vmem:[%s6062_s3 + $0x6b8] sm:$0xf0] }
 0x126   :  { %2209 = vmatpush.bf16.msra.mxu3 %v3179_v10  ;;  %v3448_v10 = vld [vmem:[%s6062_s3 + $0x5f8] sm:$0xf0]  ;;  %v3997_v61 = vld [vmem:[%s6062_s3 + $0x48c] sm:$0xf] }
 0x127   :  { %2169 = vmatpush.bf16.msra.mxu0 %v2763_v14  ;;  %2183 = vmatpush.bf16.msra.mxu1 %v2891_v51  ;;  %v5700_v14 = vpop.f32.mrf.mxu3  ;;  %v3096_v51 = vld [vmem:[%s6062_s3 + $0x338] sm:$0xf0]  ;;  %v3451_v21 = vor.u32 %v4041_v6, %v3448_v10  ;;  %v4029_v0 = vld [vmem:[%s6062_s3 + $0x58c] sm:$0xf] }
 0x128   :  { %v4065_v4 = vld [vmem:[%s6062_s3 + $0x6ac] sm:$0xf]  ;;  %v3672_v10 = vld [vmem:[%s6062_s3 + $0x7b8] sm:$0xf0]  ;;  %v3403_v12 = vor.u32 %v4029_v0, %v3400_v2 }
 0x129   :  { %2196 = vmatpush.bf16.msra.mxu2 %v3035_v20  ;;  %v4005_v20 = vld [vmem:[%s6062_s3 + $0x4cc] sm:$0xf]  ;;  %v3208_v2 = vld [vmem:[%s6062_s3 + $0x418] sm:$0xf0] }
 0x12a   :  { %2210 = vmatpush.bf16.msra.mxu3 %v3163_v23  ;;  %v3304_v23 = vld [vmem:[%s6062_s3 + $0x4d8] sm:$0xf0]  ;;  %v3981_v0 = vld [vmem:[%s6062_s3 + $0x40c] sm:$0xf] }
 0x12b   :  { %2170 = vmatpush.bf16.msra.mxu0 %v2747_v28  ;;  %2184 = vmatpush.bf16.msra.mxu1 %v2875_v32  ;;  %v3099_v28 = vor.u32 %v3953_v17, %v3096_v51  ;;  %v3949_v32 = vld [vmem:[%s6062_s3 + $0x30c] sm:$0xf]  ;;  %v3307_v38 = vor.u32 %v4005_v20, %v3304_v23  ;;  %v5768_v55 = vpop.f32.mrf.mxu2  ;;  %v3547_v17 = vor.u32 %v4065_v4, %v3544_v5  ;;  %v3528_v20 = vld [vmem:[%s6062_s3 + $0x698] sm:$0xf0] }
 0x12c   :  { %v4025_v51 = vld [vmem:[%s6062_s3 + $0x56c] sm:$0xf]  ;;  %v3656_v23 = vld [vmem:[%s6062_s3 + $0x798] sm:$0xf0] }
 0x12d   :  { %2197 = vmatpush.bf16.msra.mxu2 %v3019_v36  ;;  %v3576_v36 = vld [vmem:[%s6062_s3 + $0x6f8] sm:$0xf0]  ;;  %v4013_v4 = vld [vmem:[%s6062_s3 + $0x50c] sm:$0xf] }
 0x12e   :  { %2211 = vmatpush.bf16.msra.mxu3 %v3147_v39  ;;  %v4105_v39 = vld [vmem:[%s6062_s3 + $0x7ec] sm:$0xf]  ;;  %v3579_v47 = vor.u32 %v4073_v35, %v3576_v36  ;;  %v3368_v35 = vld [vmem:[%s6062_s3 + $0x558] sm:$0xf0] }
 0x12f   :  { %2171 = vmatpush.bf16.msra.mxu0 %v2731_v42  ;;  %2185 = vmatpush.bf16.msra.mxu1 %v2859_v46  ;;  %v2955_v42 = vor.u32 %v3917_v29, %v2952_v30  ;;  %v3083_v46 = vor.u32 %v3949_v32, %v3080_v34  ;;  %v3707_v50 = vor.u32 %v4105_v39, %v3704_v40  ;;  %v5776_v58 = vpop.f32.mrf.mxu3  ;;  %v4021_v34 = vld [vmem:[%s6062_s3 + $0x54c] sm:$0xf]  ;;  %v3512_v40 = vld [vmem:[%s6062_s3 + $0x678] sm:$0xf0] }
 0x130   :  { %v4057_v39 = vld [vmem:[%s6062_s3 + $0x66c] sm:$0xf]  ;;  %v3371_v45 = vor.u32 %v4021_v34, %v3368_v35  ;;  %v3336_v5 = vld [vmem:[%s6062_s3 + $0x518] sm:$0xf0]  ;;  %v4114_v35 = vld [vmem:[%s6065_s5 + $0x30] sm:$0xff] }
 0x131   :  { %2198 = vmatpush.bf16.msra.mxu2 %v3003_v49  ;;  %v3416_v49 = vld [vmem:[%s6062_s3 + $0x5b8] sm:$0xf0] }
 0x132   :  { %2212 = vmatpush.bf16.msra.mxu3 %v3131_v54  ;;  %v5766_v54 = vpop.f32.mrf.mxu0  ;;  %v3419_v59 = vor.u32 %v4033_v48, %v3416_v49  ;;  %v3515_v48 = vor.u32 %v4057_v39, %v3512_v40  ;;  %v4017_v49 = vld [vmem:[%s6062_s3 + $0x52c] sm:$0xf]  ;;  %v3592_v34 = vld [vmem:[%s6062_s3 + $0x718] sm:$0xf0]  ;;  %v4122_v40 = vld [vmem:[%s6065_s5 + $0x70] sm:$0xff] }
 0x133   :  { %2172 = vmatpush.bf16.msra.mxu0 %v2715_v57  ;;  %2186 = vmatpush.bf16.msra.mxu1 %v2843_v62  ;;  %v4101_v57 = vld [vmem:[%s6062_s3 + $0x7cc] sm:$0xf]  ;;  %v3272_v62 = vld [vmem:[%s6062_s3 + $0x498] sm:$0xf0]  ;;  %v5838_v30 = vpop.f32.mrf.mxu2 }
 0x134   :  { %v3275_v6 = vor.u32 %v3997_v61, %v3272_v62  ;;  %v3624_v61 = vld [vmem:[%s6062_s3 + $0x758] sm:$0xf0]  ;;  %v5889_v62 = vld [vmem:[%s6064_s4] sm:$0xf] }
 0x135   :  { %2199 = vmatpush.bf16.msra.mxu2 %v2987_v3 }
 0x136   :  { %2213 = vmatpush.bf16.msra.mxu3 %v3115_v9  ;;  %v4097_v9 = vld [vmem:[%s6062_s3 + $0x7ac] sm:$0xf] }
 0x137   :  { %2173 = vmatpush.bf16.msra.mxu0 %v2699_v15  ;;  %2187 = vmatpush.bf16.msra.mxu1 %v2827_v18  ;;  %v5810_v15 = vpop.f32.mrf.mxu1  ;;  %v3675_v18 = vor.u32 %v4097_v9, %v3672_v10  ;;  %v5846_v36 = vpop.f32.mrf.mxu3  ;;  %v4049_v9 = vld [vmem:[%s6062_s3 + $0x62c] sm:$0xf]  ;;  %v3480_v10 = vld [vmem:[%s6062_s3 + $0x638] sm:$0xf0] }
 0x139   :  { %2200 = vmatpush.bf16.msra.mxu2 %v2971_v22  ;;  %v4093_v22 = vld [vmem:[%s6062_s3 + $0x78c] sm:$0xf] }
 0x13a   :  { %2214 = vmatpush.bf16.msra.mxu3 %v3099_v28  ;;  %2174 = vmatmul.bf16.vlgmr.msra.gmra.mxu0 %v4706_v11  ;;  %v3560_v11 = vld [vmem:[%s6062_s3 + $0x6d8] sm:$0xf0]  ;;  %v5836_v29 = vpop.f32.mrf.mxu0 }
 0x13b   :  { %2222 = vmatpush.bf16.msrb.mxu0 %v3323_v19  ;;  %2236 = vmatpush.bf16.msrb.mxu1 %v3451_v21  ;;  %v3563_v63 = vor.u32 %v4069_v52, %v3560_v11  ;;  %v4061_v19 = vld [vmem:[%s6062_s3 + $0x68c] sm:$0xf]  ;;  %v3240_v28 = vld [vmem:[%s6062_s3 + $0x458] sm:$0xf0] }
 0x13c   :  { %2188 = vmatmul.bf16.vlgmr.msra.gmra.mxu1 %v4714_v16  ;;  %v3688_v16 = vld [vmem:[%s6062_s3 + $0x7d8] sm:$0xf0]  ;;  %v3531_v32 = vor.u32 %v4061_v19, %v3528_v20  ;;  %v4053_v11 = vld [vmem:[%s6062_s3 + $0x64c] sm:$0xf]  ;;  %v3339_v19 = vor.u32 %v4013_v4, %v3336_v5 }
 0x13d   :  { %2201 = vmatpush.bf16.msra.mxu2 %v2955_v42  ;;  %v3691_v3 = vor.u32 %v4101_v57, %v3688_v16  ;;  %v4089_v42 = vld [vmem:[%s6062_s3 + $0x76c] sm:$0xf]  ;;  %v4115_v20 = vld [vmem:[%s6065_s5 + $0x38] sm:$0xff] }
 0x13e   :  { %2215 = vmatpush.bf16.msra.mxu3 %v3083_v46  ;;  %v3985_v46 = vld [vmem:[%s6062_s3 + $0x42c] sm:$0xf]  ;;  %v3643_v52 = vor.u32 %v4089_v42, %v3640_v43 }
 0x13f   :  { %2223 = vmatpush.bf16.msrb.mxu0 %v3307_v38  ;;  %2237 = vmatpush.bf16.msrb.mxu1 %v3435_v41  ;;  %v3659_v38 = vor.u32 %v4093_v22, %v3656_v23  ;;  %v3243_v41 = vor.u32 %v3989_v25, %v3240_v28  ;;  %v5878_v57 = vpop.f32.mrf.mxu1  ;;  %v3483_v22 = vor.u32 %v4049_v9, %v3480_v10  ;;  %v4123_v23 = vld [vmem:[%s6065_s5 + $0x78] sm:$0xff]  ;;  %v4045_v25 = vld [vmem:[%s6062_s3 + $0x60c] sm:$0xf] }
 0x140   :  { %2202 = vmatmul.bf16.vlgmr.msra.gmra.mxu2 %v4750_v44  ;;  %v3256_v44 = vld [vmem:[%s6062_s3 + $0x478] sm:$0xf0]  ;;  %v4109_v10 = vld [vmem:[%s6065_s5 + $0x8] sm:$0xff] }
 0x141   :  { %2250 = vmatpush.bf16.msrb.mxu2 %v3579_v47  ;;  %2216 = vmatmul.bf16.vlgmr.msra.gmra.mxu3 %v4761_v26  ;;  %v3384_v26 = vld [vmem:[%s6062_s3 + $0x578] sm:$0xf0]  ;;  %v3259_v21 = vor.u32 %v3993_v13, %v3256_v44  ;;  %v5910_v44 = vpop.f32.mrf.mxu2 }
 0x142   :  { %2264 = vmatpush.bf16.msrb.mxu3 %v3707_v50  ;;  %v3387_v24 = vor.u32 %v4025_v51, %v3384_v26  ;;  %v3224_v47 = vld [vmem:[%s6062_s3 + $0x438] sm:$0xf0]  ;;  %v1951_v13 = vpop.f32.mrf.mxu0  ;;  %v4081_v51 = vld [vmem:[%s6062_s3 + $0x72c] sm:$0xf] }
 0x143   :  { %2224 = vmatpush.bf16.msrb.mxu0 %v3291_v56  ;;  %2238 = vmatpush.bf16.msrb.mxu1 %v3419_v59  ;;  %v3352_v50 = vld [vmem:[%s6062_s3 + $0x538] sm:$0xf0]  ;;  %v3227_v16 = vor.u32 %v3985_v46, %v3224_v47  ;;  %v4085_v59 = vld [vmem:[%s6062_s3 + $0x74c] sm:$0xf] }
 0x144   :  { %v3496_v56 = vld [vmem:[%s6062_s3 + $0x658] sm:$0xf0] }
 0x145   :  { %2251 = vmatpush.bf16.msrb.mxu2 %v3563_v63  ;;  %v3355_v63 = vor.u32 %v4017_v49, %v3352_v50  ;;  %v3608_v26 = vld [vmem:[%s6062_s3 + $0x738] sm:$0xf0]  ;;  %v4120_v49 = vld [vmem:[%s6065_s5 + $0x60] sm:$0xff] }
 0x146   :  { %2265 = vmatpush.bf16.msrb.mxu3 %v3691_v3  ;;  %v3499_v3 = vor.u32 %v4053_v11, %v3496_v56  ;;  %v3464_v28 = vld [vmem:[%s6062_s3 + $0x618] sm:$0xf0] }
 0x147   :  { %2225 = vmatpush.bf16.msrb.mxu0 %v3275_v6  ;;  %2239 = vmatpush.bf16.msrb.mxu1 %v3403_v12  ;;  %v3627_v6 = vor.u32 %v4085_v59, %v3624_v61  ;;  %v542_v12 = vperm.slane %v5889_v62, 0  ;;  %v1965_v39 = vpop.f32.mrf.mxu1 }
 0x149   :  { %2252 = vmatpush.bf16.msrb.mxu2 %v3547_v17  ;;  %v3211_v17 = vor.u32 %v3981_v0, %v3208_v2  ;;  %v1979_v47 = vpop.f32.mrf.mxu2  ;;  %v4110_v0 = vld [vmem:[%s6065_s5 + $0x10] sm:$0xff] }
 0x14a   :  { %2266 = vmatpush.bf16.msrb.mxu3 %v3675_v18  ;;  %v5918_v18 = vpop.f32.mrf.mxu3  ;;  %v1953_v46 = vpop.f32.mrf.mxu0 }
 0x14b   :  { %2226 = vmatpush.bf16.msrb.mxu0 %v3259_v21  ;;  %2240 = vmatpush.bf16.msrb.mxu1 %v3387_v24  ;;  %v1842_v21 = vadd.f32 %v5687_v7, %v542_v12  ;;  %v3611_v24 = vor.u32 %v4081_v51, %v3608_v26  ;;  %v4077_v7 = vld [vmem:[%s6062_s3 + $0x70c] sm:$0xf] }
 0x14d   :  { %2253 = vmatpush.bf16.msrb.mxu2 %v3531_v32  ;;  %v1840_v32 = vadd.f32 %v5614_v31, %v542_v12  ;;  %v3467_v31 = vor.u32 %v4045_v25, %v3464_v28  ;;  %v4117_v12 = vld [vmem:[%s6065_s5 + $0x48] sm:$0xff] }
 0x14e   :  { %2267 = vmatpush.bf16.msrb.mxu3 %v3659_v38  ;;  %v1856_v38 = vadd.f32 %v5738_v37, %v1842_v21  ;;  %v4113_v37 = vld [vmem:[%s6065_s5 + $0x28] sm:$0xff] }
 0x14f   :  { %2227 = vmatpush.bf16.msrb.mxu0 %v3243_v41  ;;  %2241 = vmatpush.bf16.msrb.mxu1 %v3371_v45  ;;  %v3595_v41 = vor.u32 %v4077_v7, %v3592_v34  ;;  %v1854_v42 = vadd.f32 %v5652_v53, %v1840_v32  ;;  %v543_v53 = vperm.slane %v5889_v62, 1  ;;  %v4131_v7 = vld [vmem:[%s6065_s5 + $0xb8] sm:$0xff] }
 0x150   :  { %v1870_v43 = vadd.f32 %v5768_v55, %v1856_v38 }
 0x151   :  { %2254 = vmatpush.bf16.msrb.mxu2 %v3515_v48  ;;  %v1868_v45 = vadd.f32 %v5689_v8, %v1854_v42  ;;  %v4112_v8 = vld [vmem:[%s6065_s5 + $0x20] sm:$0xff]  ;;  %v1952_v50 = vadd.f32 %v1951_v13, %v543_v53  ;;  %v1981_v61 = vpop.f32.mrf.mxu2  ;;  %v4130_v42 = vld [vmem:[%s6065_s5 + $0xb0] sm:$0xff] }
 0x152   :  { %2268 = vmatpush.bf16.msrb.mxu3 %v3643_v52  ;;  %v1993_v55 = vpop.f32.mrf.mxu3 }
 0x153   :  { %2228 = vmatpush.bf16.msrb.mxu0 %v3227_v16  ;;  %2242 = vmatpush.bf16.msrb.mxu1 %v3355_v63  ;;  %v1882_v48 = vadd.f32 %v5700_v14, %v1868_v45  ;;  %v1966_v14 = vadd.f32 %v1965_v39, %v1952_v50  ;;  %v1954_v16 = vadd.f32 %v1953_v46, %v543_v53  ;;  %v4127_v45 = vld [vmem:[%s6065_s5 + $0x98] sm:$0xff] }
 0x155   :  { %2255 = vmatpush.bf16.msrb.mxu2 %v3499_v3  ;;  %v1896_v11 = vadd.f32 %v5766_v54, %v1882_v48  ;;  %v4118_v3 = vld [vmem:[%s6065_s5 + $0x50] sm:$0xff]  ;;  %v544_v48 = vperm.slane %v5889_v62, 2 }
 0x156   :  { %2269 = vmatpush.bf16.msrb.mxu3 %v3627_v6 }
 0x157   :  { %2229 = vmatpush.bf16.msrb.mxu0 %v3211_v17  ;;  %2243 = vmatpush.bf16.msrb.mxu1 %v3339_v19  ;;  %v2007_v56 = vpop.f32.mrf.mxu0  ;;  %v1910_v54 = vadd.f32 %v5810_v15, %v1896_v11  ;;  %v4108_v19 = vld [vmem:[%s6065_s5] sm:$0xff] }
 0x159   :  { %2256 = vmatpush.bf16.msrb.mxu2 %v3483_v22 }
 0x15a   :  { %2270 = vmatpush.bf16.msrb.mxu3 %v3611_v24  ;;  %2230 = vmatmul.bf16.vlgmr.msrb.gmra.mxu0 %v4812_v27  ;;  %v4121_v27 = vld [vmem:[%s6065_s5 + $0x68] sm:$0xff]  ;;  %v1995_v63 = vpop.f32.mrf.mxu3 }
 0x15b   :  { %2550 = vmatpush.bf16.msra.mxu0 %v4115_v20  ;;  %2564 = vmatpush.bf16.msra.mxu1 %v4123_v23 }
 0x15c   :  { %2244 = vmatmul.bf16.vlgmr.msrb.gmra.mxu1 %v4823_v33  ;;  %v1884_v33 = vadd.f32 %v5776_v58, %v1870_v43  ;;  %v1967_v58 = vpop.f32.mrf.mxu1  ;;  %v4129_v43 = vld [vmem:[%s6065_s5 + $0xa8] sm:$0xff] }
 0x15d   :  { %2257 = vmatpush.bf16.msrb.mxu2 %v3467_v31  ;;  %v1968_v4 = vadd.f32 %v1967_v58, %v1954_v16 }
 0x15e   :  { %2271 = vmatpush.bf16.msrb.mxu3 %v3595_v41  ;;  %v1898_v52 = vadd.f32 %v5836_v29, %v1884_v33  ;;  %v1980_v29 = vadd.f32 %v1979_v47, %v1966_v14  ;;  %v4126_v47 = vld [vmem:[%s6065_s5 + $0x90] sm:$0xff] }
 0x15f   :  { %2551 = vmatpush.bf16.msra.mxu0 %v4114_v35  ;;  %2565 = vmatpush.bf16.msra.mxu1 %v4122_v40  ;;  %v1982_v9 = vadd.f32 %v1981_v61, %v1968_v4  ;;  %v2009_v17 = vpop.f32.mrf.mxu0 }
 0x160   :  { %2258 = vmatmul.bf16.vlgmr.msrb.gmra.mxu2 %v4860_v60  ;;  %v4111_v60 = vld [vmem:[%s6065_s5 + $0x18] sm:$0xff]  ;;  %v1912_v59 = vadd.f32 %v5878_v57, %v1898_v52  ;;  %v1924_v57 = vadd.f32 %v5838_v30, %v1910_v54  ;;  %v1994_v6 = vadd.f32 %v1993_v55, %v1980_v29  ;;  %v4124_v55 = vld [vmem:[%s6065_s5 + $0x80] sm:$0xff] }
 0x161   :  { %2272 = vmatmul.bf16.vlgmr.msrb.gmra.mxu3 %v4871_v1  ;;  %v4119_v1 = vld [vmem:[%s6065_s5 + $0x58] sm:$0xff]  ;;  %v1996_v51 = vadd.f32 %v1995_v63, %v1982_v9  ;;  %2578 = vmatpush.bf16.msra.mxu2 %v4131_v7  ;;  %v545_v7 = vperm.slane %v5889_v62, 3 }
 0x162   :  { %v1926_v2 = vadd.f32 %v5910_v44, %v1912_v59  ;;  %v2008_v13 = vadd.f32 %v2007_v56, %v1994_v6  ;;  %v1938_v44 = vadd.f32 %v5846_v36, %v1924_v57 }
 0x163   :  { %2552 = vmatpush.bf16.msra.mxu0 %v4113_v37  ;;  %2566 = vmatpush.bf16.msra.mxu1 %v4121_v27  ;;  %v2035_v30 = vpop.f32.mrf.mxu2  ;;  %v2010_v22 = vadd.f32 %v2009_v17, %v1996_v51  ;;  %v4128_v37 = vld [vmem:[%s6065_s5 + $0xa0] sm:$0xff]  ;;  %v4125_v27 = vld [vmem:[%s6065_s5 + $0x88] sm:$0xff] }
 0x164   :  { %v2021_v5 = vpop.f32.mrf.mxu1  ;;  %v1940_v15 = vadd.f32 %v5918_v18, %v1926_v2  ;;  %v2049_v26 = vpop.f32.mrf.mxu3  ;;  %v4116_v18 = vld [vmem:[%s6065_s5 + $0x40] sm:$0xff]  ;;  %v2278_v23 = vmax.f32 %v1938_v44, 0.0 }
 0x165   :  { %v2022_v21 = vadd.f32 %v2021_v5, %v2008_v13  ;;  %2579 = vmatpush.bf16.msra.mxu2 %v4130_v42 }
 0x166   :  { %v2282_v20 = vmax.f32 %v1940_v15, 0.0  ;;  %v4139_v15 = vld [vmem:[%s6065_s5 + $0xf8] sm:$0xff] }
 0x167   :  { %2553 = vmatpush.bf16.msra.mxu0 %v4112_v8  ;;  %2567 = vmatpush.bf16.msra.mxu1 %v4120_v49  ;;  %v2036_v24 = vadd.f32 %v2035_v30, %v2022_v21  ;;  %v4135_v21 = vld [vmem:[%s6065_s5 + $0xd8] sm:$0xff] }
 0x168   :  { %v2286_v36 = vpack.c.bf16 %v2282_v20, %v2278_v23  ;;  %2592 = vmatpush.bf16.msra.mxu3 %v4139_v15  ;;  %v4137_v20 = vld [vmem:[%s6065_s5 + $0xe8] sm:$0xff]  ;;  %v4134_v23 = vld [vmem:[%s6065_s5 + $0xd0] sm:$0xff] }
 0x169   :  { %v2050_v34 = vadd.f32 %v2049_v26, %v2036_v24  ;;  %2580 = vmatpush.bf16.msra.mxu2 %v4129_v43  ;;  %v4133_v24 = vld [vmem:[%s6065_s5 + $0xc8] sm:$0xff] }
 0x16b   :  { %2554 = vmatpush.bf16.msra.mxu0 %v4111_v60  ;;  %2568 = vmatpush.bf16.msra.mxu1 %v4119_v1  ;;  %v2037_v32 = vpop.f32.mrf.mxu2  ;;  %v2279_v31 = vmax.f32 %v2050_v34, 0.0 }
 0x16c   :  { %v2023_v25 = vpop.f32.mrf.mxu1  ;;  %v2051_v38 = vpop.f32.mrf.mxu3 }
 0x16d   :  { %v2024_v28 = vadd.f32 %v2023_v25, %v2010_v22  ;;  %2581 = vmatpush.bf16.msra.mxu2 %v4128_v37  ;;  %v4132_v25 = vld [vmem:[%s6065_s5 + $0xc0] sm:$0xff] }
 0x16f   :  { %2555 = vmatpush.bf16.msra.mxu0 %v4110_v0  ;;  %2569 = vmatpush.bf16.msra.mxu1 %v4118_v3  ;;  %v2038_v35 = vadd.f32 %v2037_v32, %v2024_v28 }
 0x171   :  { %v2052_v39 = vadd.f32 %v2051_v38, %v2038_v35  ;;  %2582 = vmatpush.bf16.msra.mxu2 %v4127_v45 }
 0x173   :  { %2556 = vmatpush.bf16.msra.mxu0 %v4109_v10  ;;  %2570 = vmatpush.bf16.msra.mxu1 %v4117_v12  ;;  %v2283_v40 = vmax.f32 %v2052_v39, 0.0 }
 0x175   :  { %v2287_v41 = vpack.c.bf16 %v2283_v40, %v2279_v31  ;;  %2583 = vmatpush.bf16.msra.mxu2 %v4126_v47 }
 0x177   :  { %2557 = vmatpush.bf16.msra.mxu0 %v4108_v19  ;;  %2571 = vmatpush.bf16.msra.mxu1 %v4116_v18  ;;  %v2063_v46 = vpop.f32.mrf.mxu0  ;;  %v4138_v19 = vld [vmem:[%s6065_s5 + $0xf0] sm:$0xff]  ;;  %v4136_v18 = vld [vmem:[%s6065_s5 + $0xe0] sm:$0xff] }
 0x178   :  { %v2064_v50 = vadd.f32 %v2063_v46, %v544_v48  ;;  %2593 = vmatpush.bf16.msra.mxu3 %v4138_v19 }
 0x179   :  { %v2077_v53 = vpop.f32.mrf.mxu1  ;;  %2584 = vmatpush.bf16.msra.mxu2 %v4125_v27 }
 0x17a   :  { %2558 = vmatmul.bf16.vlgmr.msra.gmra.mxu0 %v2286_v36  ;;  %2572 = vmatmul.bf16.vlgmr.msra.gmra.mxu1 %v2287_v41  ;;  %v2078_v60 = vadd.f32 %v2077_v53, %v2064_v50 }
 0x17c   :  { %2594 = vmatpush.bf16.msra.mxu3 %v4137_v20 }
 0x17d   :  { %2585 = vmatpush.bf16.msra.mxu2 %v4124_v55 }
 0x17f   :  { %v2065_v33 = vpop.f32.mrf.mxu0 }
 0x180   :  { %v2066_v11 = vadd.f32 %v2065_v33, %v544_v48  ;;  %2595 = vmatpush.bf16.msra.mxu3 %v4136_v18 }
 0x181   :  { %v2079_v52 = vpop.f32.mrf.mxu1 }
 0x182   :  { %v2080_v16 = vadd.f32 %v2079_v52, %v2066_v11 }
 0x183   :  { %v2091_v8 = vpop.f32.mrf.mxu2 }
 0x184   :  { %v2105_v49 = vpop.f32.mrf.mxu3  ;;  %v2092_v1 = vadd.f32 %v2091_v8, %v2078_v60  ;;  %2596 = vmatpush.bf16.msra.mxu3 %v4135_v21 }
 0x186   :  { %v2106_v61 = vadd.f32 %v2105_v49, %v2092_v1 }
 0x188   :  { %2597 = vmatpush.bf16.msra.mxu3 %v4134_v23 }
 0x18b   :  { %v2093_v56 = vpop.f32.mrf.mxu2 }
 0x18c   :  { %v2107_v14 = vpop.f32.mrf.mxu3  ;;  %v2094_v29 = vadd.f32 %v2093_v56, %v2080_v16  ;;  %2598 = vmatpush.bf16.msra.mxu3 %v4133_v24 }
 0x18e   :  { %v2108_v2 = vadd.f32 %v2107_v14, %v2094_v29  ;;  %v4140_v29 = vld [vmem:[%s6066_s6] ss:$0 sm:$0xff] }
 0x190   :  { %2599 = vmatpush.bf16.msra.mxu3 %v4132_v25 }
 0x197   :  { %v2119_v58 = vpop.f32.mrf.mxu0 }
 0x198   :  { %v2120_v63 = vadd.f32 %v2119_v58, %v2106_v61 }
 0x199   :  { %v2133_v59 = vpop.f32.mrf.mxu1 }
 0x19a   :  { %v2134_v4 = vadd.f32 %v2133_v59, %v2120_v63 }
 0x19f   :  { %v2121_v0 = vpop.f32.mrf.mxu0 }
 0x1a0   :  { %v2122_v57 = vadd.f32 %v2121_v0, %v2108_v2 }
 0x1a1   :  { %v2135_v6 = vpop.f32.mrf.mxu1 }
 0x1a2   :  { %v2136_v9 = vadd.f32 %v2135_v6, %v2122_v57 }
 0x1a3   :  { %v2147_v54 = vpop.f32.mrf.mxu2 }
 0x1a4   :  { %v2161_v3 = vpop.f32.mrf.mxu3  ;;  %v2148_v5 = vadd.f32 %v2147_v54, %v2134_v4 }
 0x1a6   :  { %v2162_v12 = vadd.f32 %v2161_v3, %v2148_v5 }
 0x1a8   :  { %v2280_v30 = vmax.f32 %v2162_v12, 0.0 }
 0x1ab   :  { %v2149_v10 = vpop.f32.mrf.mxu2 }
 0x1ac   :  { %v2150_v13 = vadd.f32 %v2149_v10, %v2136_v9  ;;  %v2163_v44 = vpop.f32.mrf.mxu3 }
 0x1ae   :  { %v2164_v17 = vadd.f32 %v2163_v44, %v2150_v13 }
 0x1b0   :  { %v2284_v51 = vmax.f32 %v2164_v17, 0.0 }
 0x1b2   :  { %v2288_v26 = vpack.c.bf16 %v2284_v51, %v2280_v30 }
 0x1b4   :  { %2586 = vmatmul.bf16.vlgmr.msra.gmra.mxu2 %v2288_v26 }
 0x1b7   :  { %v2175_v22 = vpop.f32.mrf.mxu0 }
 0x1b8   :  { %v2176_v35 = vadd.f32 %v2175_v22, %v545_v7 }
 0x1b9   :  { %v2189_v36 = vpop.f32.mrf.mxu1 }
 0x1ba   :  { %v2190_v31 = vadd.f32 %v2189_v36, %v2176_v35 }
 0x1bf   :  { %v2177_v28 = vpop.f32.mrf.mxu0 }
 0x1c0   :  { %v2178_v40 = vadd.f32 %v2177_v28, %v545_v7 }
 0x1c1   :  { %v2191_v38 = vpop.f32.mrf.mxu1 }
 0x1c2   :  { %v2192_v37 = vadd.f32 %v2191_v38, %v2178_v40 }
 0x1c3   :  { %v2203_v32 = vpop.f32.mrf.mxu2 }
 0x1c4   :  { %v2217_v34 = vpop.f32.mrf.mxu3  ;;  %v2204_v42 = vadd.f32 %v2203_v32, %v2190_v31 }
 0x1c6   :  { %v2218_v46 = vadd.f32 %v2217_v34, %v2204_v42 }
 0x1cb   :  { %v2205_v41 = vpop.f32.mrf.mxu2 }
 0x1cc   :  { %v2219_v43 = vpop.f32.mrf.mxu3  ;;  %v2206_v47 = vadd.f32 %v2205_v41, %v2192_v37 }
 0x1ce   :  { %v2220_v33 = vadd.f32 %v2219_v43, %v2206_v47 }
 0x1d7   :  { %v2231_v39 = vpop.f32.mrf.mxu0 }
 0x1d8   :  { %v2232_v27 = vadd.f32 %v2231_v39, %v2218_v46 }
 0x1d9   :  { %v2245_v45 = vpop.f32.mrf.mxu1 }
 0x1da   :  { %v2246_v62 = vadd.f32 %v2245_v45, %v2232_v27 }
 0x1df   :  { %v2233_v53 = vpop.f32.mrf.mxu0 }
 0x1e0   :  { %v2234_v48 = vadd.f32 %v2233_v53, %v2220_v33 }
 0x1e1   :  { %v2247_v50 = vpop.f32.mrf.mxu1 }
 0x1e2   :  { %v2248_v52 = vadd.f32 %v2247_v50, %v2234_v48 }
 0x1e3   :  { %v2259_v55 = vpop.f32.mrf.mxu2 }
 0x1e4   :  { %v2273_v8 = vpop.f32.mrf.mxu3  ;;  %v2260_v49 = vadd.f32 %v2259_v55, %v2246_v62 }
 0x1e6   :  { %v2274_v60 = vadd.f32 %v2273_v8, %v2260_v49 }
 0x1e8   :  { %v2281_v14 = vmax.f32 %v2274_v60, 0.0 }
 0x1eb   :  { %v2261_v58 = vpop.f32.mrf.mxu2 }
 0x1ec   :  { %v2262_v11 = vadd.f32 %v2261_v58, %v2248_v52  ;;  %v2275_v56 = vpop.f32.mrf.mxu3 }
 0x1ee   :  { %v2276_v1 = vadd.f32 %v2275_v56, %v2262_v11 }
 0x1f0   :  { %v2285_v16 = vmax.f32 %v2276_v1, 0.0 }
 0x1f2   :  { %v2289_v59 = vpack.c.bf16 %v2285_v16, %v2281_v14 }
 0x1f4   :  { %2600 = vmatmul.bf16.vlgmr.msra.gmra.mxu3 %v2289_v59 }
 0x1f7   :  { %v2559_v61 = vpop.f32.mrf.mxu0  ;;  %v2573_v63 = vpop.f32.mrf.mxu1 }
 0x1f8   :  { %v2560_v54 = vadd.f32 %v4140_v29, %v2559_v61 }
 0x1fa   :  { %v2574_v2 = vadd.f32 %v2573_v63, %v2560_v54 }
 0x1ff   :  { %v2561_v4 = vpop.f32.mrf.mxu0  ;;  %v2575_v6 = vpop.f32.mrf.mxu1 }
 0x200   :  { %v2562_v9 = vadd.f32 %v4140_v29, %v2561_v4 }
 0x202   :  { %v2576_v15 = vadd.f32 %v2575_v6, %v2562_v9 }
 0x237   :  { %v2587_v0 = vpop.f32.mrf.mxu2 }
 0x238   :  { %v2588_v3 = vadd.f32 %v2587_v0, %v2574_v2 }
 0x23f   :  { %v2589_v10 = vpop.f32.mrf.mxu2 }
 0x240   :  { %v2590_v12 = vadd.f32 %v2589_v10, %v2576_v15 }
 0x277   :  { %v2601_v57 = vpop.f32.mrf.mxu3 }
 0x278   :  { %v2602_v5 = vadd.f32 %v2601_v57, %v2588_v3 }
 0x27a   :  { %2606 = vst [vmem:[%s6067_s7] sm:$0xff] %v2602_v5 }
 0x27f   :  { %v2603_v13 = vpop.f32.mrf.mxu3 }
 0x280   :  { %v2604_v44 = vadd.f32 %v2603_v13, %v2590_v12 }
 0x282   :  { %2607 = vst [vmem:[%s6067_s7 + $0x8] sm:$0xff] %v2604_v44 }

</bundles_post_ra>
